<compile_context>
chip_gen: v7x
topology: tpu7x:2x2x1
jax: 0.10.0
libtpu: 0.0.40
codegen_flags: <defaults>
</compile_context>

<pallas_src>
import functools

import jax
import jax.numpy as jnp
from jax import lax
from jax.experimental import pallas as pl
from jax.experimental.pallas import tpu as pltpu

H_BERT = 768   # BERT hidden size (digester input)
D1 = 256
D2 = 256
D3 = 128       # sentence embedding size (duobert=False branch)

MAX_TB = 64    # batch-tile rows; (TB,TS)=(64,128) bf16 double-buffered tiles fit v7x's 64 MiB VMEM
MAX_TS = 128   # sequence tile (lane-dense multiple of 128) once S exceeds it


def _round_up(x, m):
    return ((x + m - 1) // m) * m


def _encoder_kernel(tok_ref, mask_ref,
                    w1_ref, b1_ref, w2_ref, b2_ref, w3_ref, b3_ref,
                    out_ref, sum_acc, cnt_acc, diag_ref,
                    *, true_b, true_s, tb, ts, need_batch_mask, need_seq_mask):
    # Grid: (batch tile b [parallel], sequence tile s [arbitrary / reduction]).
    b = pl.program_id(0)
    s = pl.program_id(1)

    @pl.when(s == 0)
    def _():
        sum_acc[...] = jnp.zeros_like(sum_acc)
        cnt_acc[...] = jnp.zeros_like(cnt_acc)
        # Static block-diagonal reduction matrix: diag[i, i*ts + t] = 1 else 0.  Built once per
        # batch tile (it is constant) so the per-step VPU cost is only the mask select below.
        col = lax.broadcasted_iota(jnp.int32, (tb, tb * ts), 1)
        row = lax.broadcasted_iota(jnp.int32, (tb, tb * ts), 0)
        rel = col - row * ts
        diag_ref[...] = jnp.where((rel >= 0) & (rel < ts), 1.0, 0.0).astype(diag_ref.dtype)

    # Keep-mask = attention mask AND in-bounds validity (ragged batch/sequence tails handled
    # here instead of a wrapper-side jnp.pad of the token tensor).  Shape (tb, ts, 1): the
    # broadcast across the 768 hidden lanes is a cheap lane-splat.
    keep = mask_ref[...] != 0                                           # (tb, ts, 1) bool
    if need_seq_mask:
        sidx = lax.broadcasted_iota(jnp.int32, (tb, ts, 1), 1)
        keep = jnp.logical_and(keep, s * ts + sidx < true_s)
    if need_batch_mask:
        bidx = lax.broadcasted_iota(jnp.int32, (tb, ts, 1), 0)
        keep = jnp.logical_and(keep, b * tb + bidx < true_b)

    # SELECT (not multiply) so NaN/Inf garbage in out-of-bounds partial-block regions can never
    # propagate into the accumulator.  Token tile stays in its storage dtype (bf16 preferred).
    tok = jnp.where(keep, tok_ref[...], jnp.zeros((), tok_ref.dtype))   # (tb, ts, H)

    # Masked sum over the sequence tile on the MXU: (tb, tb*ts) block-diagonal ones matrix
    # contracts the flattened tile (leading-dim merge = layout no-op) with f32 accumulation.
    sum_acc[...] += jnp.dot(diag_ref[...], tok.reshape(tb * ts, H_BERT),
                            preferred_element_type=jnp.float32)         # (tb, H)
    cnt_acc[...] += jnp.sum(jnp.where(keep, 1.0, 0.0), axis=1)          # (tb, 1)

    @pl.when(s == pl.num_programs(1) - 1)
    def _():
        # All-zero mask rows: sum_acc is exactly 0, so 0 * (1/1e-9) == 0, matching the reference.
        denom = jnp.maximum(cnt_acc[...], 1e-9)
        pooled = sum_acc[...] * pl.reciprocal(denom, approx=False)      # exact, still no VPU divide

        h1 = jnp.dot(pooled, w1_ref[...], preferred_element_type=jnp.float32) + b1_ref[...]
        h1 = jnp.maximum(h1, 0.0)
        h2 = jnp.dot(h1, w2_ref[...], preferred_element_type=jnp.float32) + b2_ref[...]
        h2 = jnp.maximum(h2, 0.0)
        out_ref[...] = (jnp.dot(h2, w3_ref[...], preferred_element_type=jnp.float32)
                        + b3_ref[...]).astype(out_ref.dtype)


def prepare_digester_params(params):
    """One-time conversion: PyTorch Linear (out, in) weights -> kernel (in, out), biases (1, out)."""
    w1, b1, w2, b2, w3, b3 = params
    return (jnp.asarray(w1, jnp.float32).T, jnp.asarray(b1, jnp.float32).reshape(1, -1),
            jnp.asarray(w2, jnp.float32).T, jnp.asarray(b2, jnp.float32).reshape(1, -1),
            jnp.asarray(w3, jnp.float32).T, jnp.asarray(b3, jnp.float32).reshape(1, -1))


@jax.jit
def bert_sentence_encoder(token_embeddings, attention_mask, prepared_params):
    """token_embeddings: (B, S, 768) bf16/f32, attention_mask: (B, S) int/float -> (B, 128) f32."""
    B, S, H = token_embeddings.shape
    assert H == H_BERT
    w1t, b1r, w2t, b2r, w3t, b3r = prepared_params

    # Mask is tiny; keep its narrow dtype and compare in-kernel (no wrapper-side f32 cast of the
    # big tensors -- the kernel is HBM-read-bound, so every avoided byte is wall time 1:1).
    if attention_mask.dtype == jnp.bool_:
        attention_mask = attention_mask.astype(jnp.int32)
    mask3 = attention_mask.reshape(B, S, 1)   # (TB, TS, 1) blocks -> in-kernel lane-splat broadcast

    # Tile selection.  TB a multiple of 8, <= MAX_TB, and <= ~B/2 so grid[0] >= 2 when possible
    # (keeps both v7x TensorCores busy via the "parallel" batch axis).  TS = full S for short
    # sequences (full-dim BlockSpec exemption) or 128 for long ones (lane-dense DMAs).
    if B < 8:
        TB = B
    else:
        TB = max(8, min(MAX_TB, _round_up(pl.cdiv(B, 2), 8)))
    TS = S if S <= MAX_TS else MAX_TS

    grid = (pl.cdiv(B, TB), pl.cdiv(S, TS))
    need_batch_mask = (B % TB) != 0   # ragged tails handled in-kernel; no jnp.pad of the big tensor
    need_seq_mask = (S % TS) != 0

    kernel = functools.partial(
        _encoder_kernel, true_b=B, true_s=S, tb=TB, ts=TS,
        need_batch_mask=need_batch_mask, need_seq_mask=need_seq_mask)

    out = pl.pallas_call(
        kernel,
        out_shape=jax.ShapeDtypeStruct((B, D3), jnp.float32),
        grid_spec=pltpu.PrefetchScalarGridSpec(
            num_scalar_prefetch=0,
            grid=grid,
            in_specs=[
                pl.BlockSpec((TB, TS, H_BERT), lambda b, s: (b, s, 0)),  # token embeddings tile
                pl.BlockSpec((TB, TS, 1), lambda b, s: (b, s, 0)),       # attention mask tile
                pl.BlockSpec((H_BERT, D1), lambda b, s: (0, 0)),         # W1^T (constant -> resident)
                pl.BlockSpec((1, D1), lambda b, s: (0, 0)),              # b1
                pl.BlockSpec((D1, D2), lambda b, s: (0, 0)),             # W2^T
                pl.BlockSpec((1, D2), lambda b, s: (0, 0)),              # b2
                pl.BlockSpec((D2, D3), lambda b, s: (0, 0)),             # W3^T
                pl.BlockSpec((1, D3), lambda b, s: (0, 0)),              # b3
            ],
            out_specs=pl.BlockSpec((TB, D3), lambda b, s: (b, 0)),       # resident across s
            scratch_shapes=[
                pltpu.VMEM((TB, H_BERT), jnp.float32),                   # masked-sum accumulator
                pltpu.VMEM((TB, 1), jnp.float32),                        # mask-count accumulator
                pltpu.VMEM((TB, TB * TS), token_embeddings.dtype),       # block-diagonal ones matrix
            ],
        ),
        compiler_params=pltpu.CompilerParams(
            dimension_semantics=("parallel", "arbitrary"),
            # Double-buffered (64,128,768) bf16 tiles + selected copy + weights stay under the
            # v7x 64 MiB physical VMEM; on v6e/v5e (128 MiB) this is conservative.
            vmem_limit_bytes=56 * 1024 * 1024,
        ),
    )(token_embeddings, mask3, w1t, b1r, w2t, b2r, w3t, b3r)

    return out


def init_digester_params(key):
    """Deterministic init of the digester MLP (PyTorch Linear shapes: W is (out, in))."""
    ks = jax.random.split(key, 6)

    def lin(kw, kb, fan_in, fan_out):
        bound = 1.0 / jnp.sqrt(fan_in)
        w = jax.random.uniform(kw, (fan_out, fan_in), jnp.float32, -bound, bound)
        b = jax.random.uniform(kb, (fan_out,), jnp.float32, -bound, bound)
        return w, b

    w1, b1 = lin(ks[0], ks[1], H_BERT, D1)
    w2, b2 = lin(ks[2], ks[3], D1, D2)
    w3, b3 = lin(ks[4], ks[5], D2, D3)
    return (w1, b1, w2, b2, w3, b3)


def reference_forward(token_embeddings, attention_mask, params):
    w1, b1, w2, b2, w3, b3 = params
    tok = token_embeddings.astype(jnp.float32)
    m = attention_mask.astype(jnp.float32)[:, :, None]
    pooled = jnp.sum(tok * m, axis=1) / jnp.maximum(jnp.sum(m, axis=1), 1e-9)
    h = jnp.maximum(pooled @ w1.T + b1, 0.0)
    h = jnp.maximum(h @ w2.T + b2, 0.0)
    return h @ w3.T + b3


if __name__ == "__main__":
    key = jax.random.PRNGKey(0)
    k_tok, k_params, k_tok2 = jax.random.split(key, 3)

    params = init_digester_params(k_params)
    prepared = prepare_digester_params(params)   # one-time (in,out) layout, no per-call transposes

    # --- primary small demo: batch=2, seq=8 (typical short-sentence batch) ---
    B, S = 2, 8
    token_embeddings = jax.random.normal(k_tok, (B, S, H_BERT), jnp.float32)
    lengths = jnp.array([8, 5])
    attention_mask = (jnp.arange(S)[None, :] < lengths[:, None]).astype(jnp.int32)

    # HBM-read-bound kernel: feed the BERT hidden states in bf16 (producer-side), f32 accumulate.
    tok_bf16 = token_embeddings.astype(jnp.bfloat16)

    out = jax.block_until_ready(bert_sentence_encoder(tok_bf16, attention_mask, prepared))
    ref = reference_forward(tok_bf16, attention_mask, params)
    assert out.shape == (B, D3)
    assert jnp.allclose(out, ref, atol=3e-3, rtol=3e-3), "mismatch vs reference (small case)"

    # --- ragged-tail check: B, S not multiples of the tile sizes (exercises the in-kernel
    #     validity masking that replaces the old wrapper-side jnp.pad of the token tensor) ---
    B2, S2 = 10, 200
    tok2 = jax.random.normal(k_tok2, (B2, S2, H_BERT), jnp.float32).astype(jnp.bfloat16)
    lengths2 = (jnp.arange(B2) * 17) % S2 + 1
    mask2 = (jnp.arange(S2)[None, :] < lengths2[:, None]).astype(jnp.int32)

    out2 = jax.block_until_ready(bert_sentence_encoder(tok2, mask2, prepared))
    ref2 = reference_forward(tok2, mask2, params)
    assert out2.shape == (B2, D3)
    assert jnp.allclose(out2, ref2, atol=3e-3, rtol=3e-3), "mismatch vs reference (ragged case)"

    print("KERNEL_OK")
</pallas_src>

<mosaic_0001>
module attributes {stable_mosaic.version = 11 : i64} {
  func.func @_encoder_kernel(%arg0: i32, %arg1: i32, %arg2: memref<2x8x768xbf16, #tpu.memory_space<vmem>>, %arg3: memref<2x8x1xi32, #tpu.memory_space<vmem>>, %arg4: memref<768x256xf32, #tpu.memory_space<vmem>>, %arg5: memref<1x256xf32, #tpu.memory_space<vmem>>, %arg6: memref<256x256xf32, #tpu.memory_space<vmem>>, %arg7: memref<1x256xf32, #tpu.memory_space<vmem>>, %arg8: memref<256x128xf32, #tpu.memory_space<vmem>>, %arg9: memref<1x128xf32, #tpu.memory_space<vmem>>, %arg10: memref<2x128xf32, #tpu.memory_space<vmem>>, %arg11: memref<2x768xf32, #tpu.memory_space<vmem>>, %arg12: memref<2x1xf32, #tpu.memory_space<vmem>>, %arg13: memref<2x16xbf16, #tpu.memory_space<vmem>>) attributes {dimension_semantics = [#tpu.dimension_semantics<parallel>, #tpu.dimension_semantics<arbitrary>], iteration_bounds = array<i64: 1, 1>, scalar_prefetch = 0 : i64, scratch_operands = 3 : i64, tpu.core_type = #tpu.core_type<tc>, window_params = [{transform_indices = @transform_0, window_bounds = array<i64: 2, 8, 768>}, {transform_indices = @transform_1, window_bounds = array<i64: 2, 8, 1>}, {pipeline_mode = #tpu.pipeline_mode<synchronous>, transform_indices = @transform_2, window_bounds = array<i64: 768, 256>}, {pipeline_mode = #tpu.pipeline_mode<synchronous>, transform_indices = @transform_3, window_bounds = array<i64: 1, 256>}, {pipeline_mode = #tpu.pipeline_mode<synchronous>, transform_indices = @transform_4, window_bounds = array<i64: 256, 256>}, {pipeline_mode = #tpu.pipeline_mode<synchronous>, transform_indices = @transform_5, window_bounds = array<i64: 1, 256>}, {pipeline_mode = #tpu.pipeline_mode<synchronous>, transform_indices = @transform_6, window_bounds = array<i64: 256, 128>}, {pipeline_mode = #tpu.pipeline_mode<synchronous>, transform_indices = @transform_7, window_bounds = array<i64: 1, 128>}, {transform_indices = @transform_8, window_bounds = array<i64: 2, 128>}]} {
    %c0_i32 = arith.constant 0 : i32
    %0 = arith.cmpi eq, %arg1, %c0_i32 : i32
    %1 = arith.extui %0 : i1 to i32
    %c0_i32_0 = arith.constant 0 : i32
    %2 = arith.cmpi ne, %1, %c0_i32_0 : i32
    scf.if %2 {
      %cst_23 = arith.constant 0.000000e+00 : f32
      %27 = vector.broadcast %cst_23 : f32 to vector<2x768xf32>
      %c0_24 = arith.constant 0 : index
      %c0_25 = arith.constant 0 : index
      %28 = vector.load %arg11[%c0_24, %c0_25] : memref<2x768xf32, #tpu.memory_space<vmem>>, vector<2x768xf32>
      tpu.vector_store %arg11[%c0_24, %c0_25], %27 {strides = array<i32>} : memref<2x768xf32, #tpu.memory_space<vmem>>, vector<2x768xf32>,
      %cst_26 = arith.constant 0.000000e+00 : f32
      %29 = vector.broadcast %cst_26 : f32 to vector<2x1xf32>
      %c0_27 = arith.constant 0 : index
      %c0_28 = arith.constant 0 : index
      %30 = vector.load %arg12[%c0_27, %c0_28] : memref<2x1xf32, #tpu.memory_space<vmem>>, vector<2x1xf32>
      tpu.vector_store %arg12[%c0_27, %c0_28], %29 {strides = array<i32>} : memref<2x1xf32, #tpu.memory_space<vmem>>, vector<2x1xf32>,
      %31 = tpu.iota {dimensions = array<i32: 1>} : vector<2x16xi32>
      %32 = tpu.iota {dimensions = array<i32: 0>} : vector<2x16xi32>
      %c8_i32 = arith.constant 8 : i32
      %33 = vector.broadcast %c8_i32 : i32 to vector<2x16xi32>
      %34 = arith.muli %32, %33 : vector<2x16xi32>
      %35 = arith.subi %31, %34 : vector<2x16xi32>
      %c0_i32_29 = arith.constant 0 : i32
      %36 = vector.broadcast %c0_i32_29 : i32 to vector<2x16xi32>
      %37 = arith.cmpi sge, %35, %36 : vector<2x16xi32>
      %c8_i32_30 = arith.constant 8 : i32
      %38 = vector.broadcast %c8_i32_30 : i32 to vector<2x16xi32>
      %39 = arith.cmpi slt, %35, %38 : vector<2x16xi32>
      %40 = arith.andi %37, %39 : vector<2x16xi1>
      %cst_31 = arith.constant 1.000000e+00 : f32
      %cst_32 = arith.constant 0.000000e+00 : f32
      %41 = vector.broadcast %cst_31 : f32 to vector<2x16xf32>
      %42 = vector.broadcast %cst_32 : f32 to vector<2x16xf32>
      %43 = arith.select %40, %41, %42 : vector<2x16xi1>, vector<2x16xf32>
      %44 = arith.truncf %43 : vector<2x16xf32> to vector<2x16xbf16>
      %c0_33 = arith.constant 0 : index
      %c0_34 = arith.constant 0 : index
      %45 = vector.load %arg13[%c0_33, %c0_34] : memref<2x16xbf16, #tpu.memory_space<vmem>>, vector<2x16xbf16>
      tpu.vector_store %arg13[%c0_33, %c0_34], %44 {strides = array<i32>} : memref<2x16xbf16, #tpu.memory_space<vmem>>, vector<2x16xbf16>,
    } else {
    }
    %c0 = arith.constant 0 : index
    %c0_1 = arith.constant 0 : index
    %c0_2 = arith.constant 0 : index
    %3 = vector.load %arg3[%c0, %c0_1, %c0_2] : memref<2x8x1xi32, #tpu.memory_space<vmem>>, vector<2x8x1xi32>
    %c0_i32_3 = arith.constant 0 : i32
    %4 = vector.broadcast %c0_i32_3 : i32 to vector<2x8x1xi32>
    %5 = arith.cmpi ne, %3, %4 : vector<2x8x1xi32>
    %c0_4 = arith.constant 0 : index
    %c0_5 = arith.constant 0 : index
    %c0_6 = arith.constant 0 : index
    %6 = vector.load %arg2[%c0_4, %c0_5, %c0_6] : memref<2x8x768xbf16, #tpu.memory_space<vmem>>, vector<2x8x768xbf16>
    %cst = arith.constant 0.000000e+00 : bf16
    %7 = vector.shape_cast %5 : vector<2x8x1xi1> to vector<2x8x1xi1>
    %8 = vector.broadcast %7 : vector<2x8x1xi1> to vector<2x8x768xi1>
    %9 = vector.broadcast %cst : bf16 to vector<2x8x768xbf16>
    %10 = arith.select %8, %6, %9 : vector<2x8x768xi1>, vector<2x8x768xbf16>
    %c0_7 = arith.constant 0 : index
    %c0_8 = arith.constant 0 : index
    %11 = vector.load %arg11[%c0_7, %c0_8] : memref<2x768xf32, #tpu.memory_space<vmem>>, vector<2x768xf32>
    %c0_9 = arith.constant 0 : index
    %c0_10 = arith.constant 0 : index
    %12 = vector.load %arg13[%c0_9, %c0_10] : memref<2x16xbf16, #tpu.memory_space<vmem>>, vector<2x16xbf16>
    %13 = vector.shape_cast %10 : vector<2x8x768xbf16> to vector<16x768xbf16>
    %cst_11 = arith.constant dense<0.000000e+00> : vector<2x768xf32>
    %14 = tpu.matmul %12, %13, %cst_11 {dimension_numbers = #tpu.dot_dimension_numbers<[1], [0], [0], [1], [0, 0, 1, 1], [], []>} : vector<2x16xbf16>, vector<16x768xbf16>, vector<2x768xf32> -> vector<2x768xf32>
    %15 = arith.addf %11, %14 : vector<2x768xf32>
    %c0_12 = arith.constant 0 : index
    %c0_13 = arith.constant 0 : index
    %16 = vector.load %arg11[%c0_12, %c0_13] : memref<2x768xf32, #tpu.memory_space<vmem>>, vector<2x768xf32>
    tpu.vector_store %arg11[%c0_12, %c0_13], %15 {strides = array<i32>} : memref<2x768xf32, #tpu.memory_space<vmem>>, vector<2x768xf32>,
    %c0_14 = arith.constant 0 : index
    %c0_15 = arith.constant 0 : index
    %17 = vector.load %arg12[%c0_14, %c0_15] : memref<2x1xf32, #tpu.memory_space<vmem>>, vector<2x1xf32>
    %cst_16 = arith.constant 1.000000e+00 : f32
    %cst_17 = arith.constant 0.000000e+00 : f32
    %18 = vector.broadcast %cst_16 : f32 to vector<2x8x1xf32>
    %19 = vector.broadcast %cst_17 : f32 to vector<2x8x1xf32>
    %20 = arith.select %5, %18, %19 : vector<2x8x1xi1>, vector<2x8x1xf32>
    %cst_18 = arith.constant dense<0.000000e+00> : vector<2x1xf32>
    %21 = vector.multi_reduction <add>, %20, %cst_18 [1] : vector<2x8x1xf32> to vector<2x1xf32>
    %22 = arith.addf %17, %21 : vector<2x1xf32>
    %c0_19 = arith.constant 0 : index
    %c0_20 = arith.constant 0 : index
    %23 = vector.load %arg12[%c0_19, %c0_20] : memref<2x1xf32, #tpu.memory_space<vmem>>, vector<2x1xf32>
    tpu.vector_store %arg12[%c0_19, %c0_20], %22 {strides = array<i32>} : memref<2x1xf32, #tpu.memory_space<vmem>>, vector<2x1xf32>,
    %c0_i32_21 = arith.constant 0 : i32
    %24 = arith.cmpi eq, %arg1, %c0_i32_21 : i32
    %25 = arith.extui %24 : i1 to i32
    %c0_i32_22 = arith.constant 0 : i32
    %26 = arith.cmpi ne, %25, %c0_i32_22 : i32
    scf.if %26 {
      %c0_23 = arith.constant 0 : index
      %c0_24 = arith.constant 0 : index
      %27 = vector.load %arg12[%c0_23, %c0_24] : memref<2x1xf32, #tpu.memory_space<vmem>>, vector<2x1xf32>
      %cst_25 = arith.constant 9.99999971E-10 : f32
      %28 = vector.broadcast %cst_25 : f32 to vector<2x1xf32>
      %29 = arith.maximumf %27, %28 : vector<2x1xf32>
      %c0_26 = arith.constant 0 : index
      %c0_27 = arith.constant 0 : index
      %30 = vector.load %arg11[%c0_26, %c0_27] : memref<2x768xf32, #tpu.memory_space<vmem>>, vector<2x768xf32>
      %31 = tpu.reciprocal %29 : vector<2x1xf32> -> vector<2x1xf32>
      %32 = vector.broadcast %31 : vector<2x1xf32> to vector<2x768xf32>
      %33 = arith.mulf %30, %32 : vector<2x768xf32>
      %c0_28 = arith.constant 0 : index
      %c0_29 = arith.constant 0 : index
      %34 = vector.load %arg4[%c0_28, %c0_29] : memref<768x256xf32, #tpu.memory_space<vmem>>, vector<768x256xf32>
      %cst_30 = arith.constant dense<0.000000e+00> : vector<2x256xf32>
      %35 = tpu.matmul %33, %34, %cst_30 {dimension_numbers = #tpu.dot_dimension_numbers<[1], [0], [0], [1], [0, 0, 1, 1], [], []>} : vector<2x768xf32>, vector<768x256xf32>, vector<2x256xf32> -> vector<2x256xf32>
      %c0_31 = arith.constant 0 : index
      %c0_32 = arith.constant 0 : index
      %36 = vector.load %arg5[%c0_31, %c0_32] : memref<1x256xf32, #tpu.memory_space<vmem>>, vector<1x256xf32>
      %37 = vector.broadcast %36 : vector<1x256xf32> to vector<2x256xf32>
      %38 = arith.addf %35, %37 : vector<2x256xf32>
      %cst_33 = arith.constant 0.000000e+00 : f32
      %39 = vector.broadcast %cst_33 : f32 to vector<2x256xf32>
      %40 = arith.maximumf %38, %39 : vector<2x256xf32>
      %c0_34 = arith.constant 0 : index
      %c0_35 = arith.constant 0 : index
      %41 = vector.load %arg6[%c0_34, %c0_35] : memref<256x256xf32, #tpu.memory_space<vmem>>, vector<256x256xf32>
      %cst_36 = arith.constant dense<0.000000e+00> : vector<2x256xf32>
      %42 = tpu.matmul %40, %41, %cst_36 {dimension_numbers = #tpu.dot_dimension_numbers<[1], [0], [0], [1], [0, 0, 1, 1], [], []>} : vector<2x256xf32>, vector<256x256xf32>, vector<2x256xf32> -> vector<2x256xf32>
      %c0_37 = arith.constant 0 : index
      %c0_38 = arith.constant 0 : index
      %43 = vector.load %arg7[%c0_37, %c0_38] : memref<1x256xf32, #tpu.memory_space<vmem>>, vector<1x256xf32>
      %44 = vector.broadcast %43 : vector<1x256xf32> to vector<2x256xf32>
      %45 = arith.addf %42, %44 : vector<2x256xf32>
      %cst_39 = arith.constant 0.000000e+00 : f32
      %46 = vector.broadcast %cst_39 : f32 to vector<2x256xf32>
      %47 = arith.maximumf %45, %46 : vector<2x256xf32>
      %c0_40 = arith.constant 0 : index
      %c0_41 = arith.constant 0 : index
      %48 = vector.load %arg8[%c0_40, %c0_41] : memref<256x128xf32, #tpu.memory_space<vmem>>, vector<256x128xf32>
      %cst_42 = arith.constant dense<0.000000e+00> : vector<2x128xf32>
      %49 = tpu.matmul %47, %48, %cst_42 {dimension_numbers = #tpu.dot_dimension_numbers<[1], [0], [0], [1], [0, 0, 1, 1], [], []>} : vector<2x256xf32>, vector<256x128xf32>, vector<2x128xf32> -> vector<2x128xf32>
      %c0_43 = arith.constant 0 : index
      %c0_44 = arith.constant 0 : index
      %50 = vector.load %arg9[%c0_43, %c0_44] : memref<1x128xf32, #tpu.memory_space<vmem>>, vector<1x128xf32>
      %51 = vector.broadcast %50 : vector<1x128xf32> to vector<2x128xf32>
      %52 = arith.addf %49, %51 : vector<2x128xf32>
      %c0_45 = arith.constant 0 : index
      %c0_46 = arith.constant 0 : index
      %53 = vector.load %arg10[%c0_45, %c0_46] : memref<2x128xf32, #tpu.memory_space<vmem>>, vector<2x128xf32>
      tpu.vector_store %arg10[%c0_45, %c0_46], %52 {strides = array<i32>} : memref<2x128xf32, #tpu.memory_space<vmem>>, vector<2x128xf32>,
    } else {
    }
    return
  }
  func.func @transform_0(%arg0: i32, %arg1: i32) -> (i32, i32, i32) {
    %c0_i32 = arith.constant 0 : i32
    %c0_i32_0 = arith.constant 0 : i32
    return %arg0, %arg1, %c0_i32 : i32, i32, i32
  }
  func.func @transform_1(%arg0: i32, %arg1: i32) -> (i32, i32, i32) {
    %c0_i32 = arith.constant 0 : i32
    %c0_i32_0 = arith.constant 0 : i32
    return %arg0, %arg1, %c0_i32 : i32, i32, i32
  }
  func.func @transform_2(%arg0: i32, %arg1: i32) -> (i32, i32) {
    %c0_i32 = arith.constant 0 : i32
    %c0_i32_0 = arith.constant 0 : i32
    %c0_i32_1 = arith.constant 0 : i32
    return %c0_i32, %c0_i32_0 : i32, i32
  }
  func.func @transform_3(%arg0: i32, %arg1: i32) -> (i32, i32) {
    %c0_i32 = arith.constant 0 : i32
    %c0_i32_0 = arith.constant 0 : i32
    %c0_i32_1 = arith.constant 0 : i32
    return %c0_i32, %c0_i32_0 : i32, i32
  }
  func.func @transform_4(%arg0: i32, %arg1: i32) -> (i32, i32) {
    %c0_i32 = arith.constant 0 : i32
    %c0_i32_0 = arith.constant 0 : i32
    %c0_i32_1 = arith.constant 0 : i32
    return %c0_i32, %c0_i32_0 : i32, i32
  }
  func.func @transform_5(%arg0: i32, %arg1: i32) -> (i32, i32) {
    %c0_i32 = arith.constant 0 : i32
    %c0_i32_0 = arith.constant 0 : i32
    %c0_i32_1 = arith.constant 0 : i32
    return %c0_i32, %c0_i32_0 : i32, i32
  }
  func.func @transform_6(%arg0: i32, %arg1: i32) -> (i32, i32) {
    %c0_i32 = arith.constant 0 : i32
    %c0_i32_0 = arith.constant 0 : i32
    %c0_i32_1 = arith.constant 0 : i32
    return %c0_i32, %c0_i32_0 : i32, i32
  }
  func.func @transform_7(%arg0: i32, %arg1: i32) -> (i32, i32) {
    %c0_i32 = arith.constant 0 : i32
    %c0_i32_0 = arith.constant 0 : i32
    %c0_i32_1 = arith.constant 0 : i32
    return %c0_i32, %c0_i32_0 : i32, i32
  }
  func.func @transform_8(%arg0: i32, %arg1: i32) -> (i32, i32) {
    %c0_i32 = arith.constant 0 : i32
    %c0_i32_0 = arith.constant 0 : i32
    return %arg0, %c0_i32 : i32, i32
  }
}

</mosaic_0001>

<bundles_post_ra>
// kernel: bert_sentence_encoder.1
= control target key start
LH: loop header
LB: loop body
LE: loop exit
PB: predicated region body
PF: predicated region fallthrough
CT: control target
= control target key end

     0   :  { %13 = vsyncpa [#allocation6], 0  ;;  %s1774_s0 = inlined_call_operand.hbm [shape: bf16[2,8,768], index: 0, kind: input, shape index: {}]   ;;  %s1775_s1 = inlined_call_operand.vmem [shape: s32[2,8,1], index: 1, kind: input, shape index: {}]   ;;  %s1776_s2 = inlined_call_operand.hbm [shape: f32[768,256], index: 2, kind: input, shape index: {}]   ;;  %s1777_s3 = inlined_call_operand.vmem [shape: f32[1,256], index: 3, kind: input, shape index: {}]   ;;  %s1778_s4 = inlined_call_operand.hbm [shape: f32[256,256], index: 4, kind: input, shape index: {}]   ;;  %s1779_s5 = inlined_call_operand.vmem [shape: f32[1,256], index: 5, kind: input, shape index: {}]   ;;  %s1780_s6 = inlined_call_operand.hbm [shape: f32[256,128], index: 6, kind: input, shape index: {}]   ;;  %s1781_s7 = inlined_call_operand.vmem [shape: f32[1,128], index: 7, kind: input, shape index: {}]   ;;  %s1782_s8 = inlined_call_operand.hbm [shape: f32[2,128], index: 8, kind: output, shape index: {}]  }
   0x1   :  { %14 = vsyncpa [#allocation9], 0 }
   0x2   :  { %15 = vsyncpa [#allocation12], 0 }
   0x3   :  { %16 = vsyncpa [#allocation7], 0  ;;  %s1584_s27 = smov [#allocation8]   ;;  %s1466_s9 = scalar_lea.hbm %s1776_s2, 24576 }
   0x4   :  { %s36_s28 = sshll.u32 %s1584_s27, 4  ;;  %p1467_p0 = scmp.ne.s32.totalorder %s1776_s2, %s1466_s9  ;;  %s37_s28 = int_to_ptr.vmem [resolvable:$true] %s36_s28 }
   0x5   :  { %p1470_p1 = scmp.lt.u32.totalorder %s1466_s9, %s1776_s2 }
   0x7   :  { %p1472_p2 = pnand %p1470_p1, %p1467_p0 }
   0x9   :  { %1475 = shalt.err (!%p1472_p2)
}
   0xa   :  { %s1476_s14 = scalar_lea.vmem %s37_s28, 24576  ;;  %p1481_p4 = scmp.lt.s32.totalorder %s37_s28, %s37_s28 }
   0xb   :  { %p1477_p3 = scmp.ne.s32.totalorder %s37_s28, %s1476_s14  ;;  %p1482_p5 = scmp.lt.s32.totalorder %s1476_s14, %s1476_s14 }
   0xd   :  { %p1483_p6 = por %p1482_p5, %p1481_p4 }
   0xf   :  { %p1484_p7 = pnand %p1483_p6, %p1477_p3 }
  0x11   :  { %1487 = shalt.err (!%p1484_p7)
}
  0x12   :  { %s1585_s15 = smov 256   ;;  %s1586_s16 = smov 16  }
  0x13   :  { %42 = dma.hbm_to_vmem [thread:$0]  %s1776_s2, 24576, %s37_s28, [#allocation9], %s1585_s15, %s1585_s15, %s1586_s16  }
  0x14   :  { %s1587_s19 = smov [#allocation5]   ;;  %s1488_s23 = scalar_lea.hbm %s1774_s0, 768 }
  0x15   :  { %s22_s20 = sshll.u32 %s1587_s19, 4  ;;  %p1489_p8 = scmp.ne.s32.totalorder %s1774_s0, %s1488_s23  ;;  %s23_s20 = int_to_ptr.vmem [resolvable:$true] %s22_s20 }
  0x16   :  { %p1492_p9 = scmp.lt.u32.totalorder %s1488_s23, %s1774_s0 }
  0x18   :  { %p1494_p10 = pnand %p1492_p9, %p1489_p8 }
  0x1a   :  { %1497 = shalt.err (!%p1494_p10)
}
  0x1b   :  { %s1498_s29 = scalar_lea.vmem %s23_s20, 768  ;;  %p1503_p12 = scmp.lt.s32.totalorder %s23_s20, %s23_s20 }
  0x1c   :  { %p1499_p11 = scmp.ne.s32.totalorder %s23_s20, %s1498_s29  ;;  %p1504_p13 = scmp.lt.s32.totalorder %s1498_s29, %s1498_s29 }
  0x1e   :  { %p1505_p0 = por %p1504_p13, %p1503_p12 }
  0x20   :  { %p1506_p1 = pnand %p1505_p0, %p1499_p11 }
  0x22   :  { %1509 = shalt.err (!%p1506_p1)
}
  0x23   :  { %s1588_s2 = smov 384   ;;  %s1589_s28 = smov 24  }
  0x24   :  { %28 = dma.hbm_to_vmem [thread:$0]  %s1774_s0, 768, %s23_s20, [#allocation6], %s1588_s2, %s1588_s2, %s1589_s28  }
  0x25   :  { %s1590_s10 = smov [#allocation10]   ;;  %s1591_s12 = smov [#allocation11]  }
  0x26   :  { %s50_s11 = sshll.u32 %s1590_s10, 4  ;;  %s64_s13 = sshll.u32 %s1591_s12, 4  ;;  %s51_s11 = int_to_ptr.vmem [resolvable:$true] %s50_s11  ;;  %s1671_s13 = int_to_ptr.vmem [resolvable:$true] %s64_s13 }
  0x27   :  { %s1510_s18 = scalar_lea.hbm %s1778_s4, 8192 }
  0x28   :  { %p1511_p2 = scmp.ne.s32.totalorder %s1778_s4, %s1510_s18  ;;  %p1514_p3 = scmp.lt.u32.totalorder %s1510_s18, %s1778_s4 }
  0x2a   :  { %p1516_p4 = pnand %p1514_p3, %p1511_p2 }
  0x2c   :  { %1519 = shalt.err (!%p1516_p4)
}
  0x2d   :  { %s1520_s0 = scalar_lea.vmem %s51_s11, 8192  ;;  %p1525_p6 = scmp.lt.s32.totalorder %s51_s11, %s51_s11 }
  0x2e   :  { %p1521_p5 = scmp.ne.s32.totalorder %s51_s11, %s1520_s0  ;;  %p1526_p7 = scmp.lt.s32.totalorder %s1520_s0, %s1520_s0 }
  0x30   :  { %p1527_p8 = por %p1526_p7, %p1525_p6 }
  0x32   :  { %p1528_p9 = pnand %p1527_p8, %p1521_p5 }
  0x34   :  { %1531 = shalt.err (!%p1528_p9)
}
  0x35   :  { %56 = dma.hbm_to_vmem [thread:$0]  %s1778_s4, 8192, %s51_s11, [#allocation9], %s1585_s15, %s1585_s15, %s1586_s16  }
  0x36   :  { %s1532_s27 = scalar_lea.hbm %s1780_s6, 4096 }
  0x37   :  { %p1533_p10 = scmp.ne.s32.totalorder %s1780_s6, %s1532_s27  ;;  %p1536_p11 = scmp.lt.u32.totalorder %s1532_s27, %s1780_s6 }
  0x39   :  { %p1538_p12 = pnand %p1536_p11, %p1533_p10 }
  0x3b   :  { %1541 = shalt.err (!%p1538_p12)
}
  0x3c   :  { %s1542_s9 = scalar_lea.vmem %s1671_s13, 4096  ;;  %p1547_p0 = scmp.lt.s32.totalorder %s1671_s13, %s1671_s13 }
  0x3d   :  { %p1543_p13 = scmp.ne.s32.totalorder %s1671_s13, %s1542_s9  ;;  %p1548_p1 = scmp.lt.s32.totalorder %s1542_s9, %s1542_s9 }
  0x3f   :  { %p1549_p2 = por %p1548_p1, %p1547_p0 }
  0x41   :  { %p1550_p3 = pnand %p1549_p2, %p1543_p13 }
  0x43   :  { %1553 = shalt.err (!%p1550_p3)
}
  0x44   :  { %s1592_s4 = smov 128   ;;  %s1593_s15 = smov 8  }
  0x45   :  { %70 = dma.hbm_to_vmem [thread:$0]  %s1780_s6, 4096, %s1671_s13, [#allocation12], %s1592_s4, %s1592_s4, %s1593_s15  }
  0x46   :  { %1576 = dma.done.wait [#allocation6], 768  }
  0x47   :  { %1577 = vsyncadd [#allocation6], 4294966528 }
  0x48   :  { %1578 = dma.done.wait [#allocation9], 32768  }
  0x49   :  { %1579 = vsyncadd [#allocation9], 4294934528 }
  0x4a   :  { %1580 = dma.done.wait [#allocation12], 4096  }
  0x4b   :  { %1581 = vsyncadd [#allocation12], 4294963200  ;;  %vm92_vm0 = vcmask 1024   ;;  %v94_v0 = vlaneseq  ;;  %v1594_v1 = vmov 0   ;;  %v1595_v2 = vmov 0.0   ;;  %v107_v7 = vld [vmem:[%s1775_s1] sm:$0xff] }
  0x4c   :  { %1462 = vset.pattern.permute.xlu0 %v1594_v1  ;;  %93 = vst.msk [vmem:[#allocation3] sm:$0x3] %vm92_vm0, %v1595_v2  ;;  %91 = vst [vmem:[#allocation2 + $0x8] sm:$0xf] %v1595_v2  ;;  %204 = vmatprep.mubr.bf16.mxu1 %v1594_v1  ;;  %vm335_vm1 = vcmask 7168   ;;  %v108_v8 = vld [vmem:[%s1775_s1 + $0x8] sm:$0xff] }
  0x4d   :  { %v95_v3 = vand.u32 127, %v94_v0  ;;  %v1708_v4 = vshrl.u32 %v94_v0, 7  ;;  %1463 = vset.pattern.permute.xlu1 %v1594_v1  ;;  %vm109_vm4 = vcmp.ne.s32.totalorder %v107_v7, 0  ;;  %vm110_vm5 = vcmp.ne.s32.totalorder %v108_v8, 0  ;;  %v381_v33 = vld [vmem:[#allocation8 + $0x8] sm:$0xff]  ;;  %v383_v34 = vld [vmem:[#allocation8 + $0x18] sm:$0xff] }
  0x4e   :  { %v117_v9 = vsel %vm109_vm4, 1, %v1594_v1  ;;  %v333_v10 = vsel %vm109_vm4, 1.0, %v1595_v2  ;;  %v334_v11 = vsel %vm110_vm5, 1.0, %v1595_v2  ;;  %vm105_vm7 = vcmask 122880   ;;  %v380_v37 = vld [vmem:[#allocation8] sm:$0xff]  ;;  %v382_v38 = vld [vmem:[#allocation8 + $0x10] sm:$0xff] }
  0x4f   :  { %v98_v5 = vmul.u32 8, %v1708_v4  ;;  %v336_v13 = vsel %vm335_vm1, %v333_v10, 0.0  ;;  %120 = vperm.xlu0 %1462, %v117_v9   ;;  %v343_v14 = vsel %vm335_vm1, %v334_v11, 0.0  ;;  %v118_v17 = vsel %vm110_vm5, 1, %v1594_v1  ;;  %v385_v40 = vld [vmem:[#allocation8 + $0x28] sm:$0xff]  ;;  %v387_v41 = vld [vmem:[#allocation8 + $0x38] sm:$0xff] }
  0x50   :  { %v337_v16 = vrot.slane %v336_v13, 4  ;;  %v344_v18 = vrot.slane %v343_v14, 4  ;;  %vm352_vm8 = vcmask 1041409   ;;  %v1153_v36 = vpack.c.bf16 %v383_v34, %v381_v33  ;;  %v384_v42 = vld [vmem:[#allocation8 + $0x20] sm:$0xff]  ;;  %v386_v44 = vld [vmem:[#allocation8 + $0x30] sm:$0xff]  ;;  %v389_v46 = vld [vmem:[#allocation8 + $0x48] sm:$0xff] }
  0x51   :  { %v99_v6 = vsub.s32 %v95_v3, %v98_v5  ;;  %v1155_v39 = vpack.c.bf16 %v382_v38, %v380_v37  ;;  %v1157_v43 = vpack.c.bf16 %v387_v41, %v385_v40  ;;  %v1159_v45 = vpack.c.bf16 %v386_v44, %v384_v42  ;;  %v391_v47 = vld [vmem:[#allocation8 + $0x58] sm:$0xff]  ;;  %v388_v48 = vld [vmem:[#allocation8 + $0x40] sm:$0xff]  ;;  %v390_v49 = vld [vmem:[#allocation8 + $0x50] sm:$0xff] }
  0x52   :  { %v338_v19 = vadd.f32 %v337_v16, %v336_v13  ;;  %v345_v20 = vadd.f32 %v344_v18, %v343_v14  ;;  %1154 = vmatprep.subr.bf16.mxu0 %v1153_v36  ;;  %v1161_v50 = vpack.c.bf16 %v391_v47, %v389_v46  ;;  %v1163_v51 = vpack.c.bf16 %v390_v49, %v388_v48  ;;  %v393_v52 = vld [vmem:[#allocation8 + $0x68] sm:$0xff]  ;;  %v395_v53 = vld [vmem:[#allocation8 + $0x78] sm:$0xff]  ;;  %v392_v54 = vld [vmem:[#allocation8 + $0x60] sm:$0xff] }
  0x53   :  { %vm100_vm2 = vcmp.ge.s32.totalorder %v99_v6, 0  ;;  %vm101_vm3 = vcmp.lt.s32.totalorder %v99_v6, 8  ;;  %123 = vperm.xlu0 %1462, %v118_v17   ;;  %v332_v29 = vld [vmem:[#allocation3] sm:$0x3]  ;;  %1156 = vmatpush1.bf16.msra.mxu0 %v1155_v39  ;;  %v1165_v55 = vpack.c.bf16 %v395_v53, %v393_v52  ;;  %v394_v56 = vld [vmem:[#allocation8 + $0x70] sm:$0xff]  ;;  %v399_v60 = vld [vmem:[#allocation8 + $0x98] sm:$0xff] }
  0x54   :  { %vm102_vm6 = vmand %vm100_vm2, %vm101_vm3  ;;  %v339_v21 = vrot.slane %v338_v19, 2  ;;  %v346_v22 = vrot.slane %v345_v20, 2  ;;  %1158 = vmatprep.subr.bf16.mxu0 %v1157_v43  ;;  %v1167_v57 = vpack.c.bf16 %v394_v56, %v392_v54  ;;  %v397_v59 = vld [vmem:[#allocation8 + $0x88] sm:$0xff]  ;;  %v396_v61 = vld [vmem:[#allocation8 + $0x80] sm:$0xff]  ;;  %vm168_vm13 = vcmask 130048  }
  0x55   :  { %v103_v12 = vsel %vm102_vm6, 1.0, %v1595_v2  ;;  %v1169_v62 = vpack.c.bf16 %v399_v60, %v397_v59  ;;  %v398_v63 = vld [vmem:[#allocation8 + $0x90] sm:$0xff]  ;;  %v401_v2 = vld [vmem:[#allocation8 + $0xa8] sm:$0xff]  ;;  %v403_v3 = vld [vmem:[#allocation8 + $0xb8] sm:$0xff] }
  0x56   :  { %v104_v15 = vpack.c.bf16 %v103_v12, %v103_v12  ;;  %v340_v23 = vadd.f32 %v339_v21, %v338_v19  ;;  %v347_v24 = vadd.f32 %v346_v22, %v345_v20  ;;  %v1171_v0 = vpack.c.bf16 %v398_v63, %v396_v61  ;;  %v400_v5 = vld [vmem:[#allocation8 + $0xa0] sm:$0xff]  ;;  %v402_v7 = vld [vmem:[#allocation8 + $0xb0] sm:$0xff]  ;;  %v405_v9 = vld [vmem:[#allocation8 + $0xc8] sm:$0xff] }
  0x57   :  { %1160 = vmatpush1.bf16.msra.mxu0 %v1159_v45  ;;  %v1173_v6 = vpack.c.bf16 %v403_v3, %v401_v2  ;;  %v1175_v8 = vpack.c.bf16 %v402_v7, %v400_v5  ;;  %v407_v10 = vld [vmem:[#allocation8 + $0xd8] sm:$0xff]  ;;  %v404_v11 = vld [vmem:[#allocation8 + $0xc0] sm:$0xff]  ;;  %v406_v13 = vld [vmem:[#allocation8 + $0xd0] sm:$0xff] }
  0x58   :  { %106 = vst.msk [vmem:[#allocation4] sm:$0x1] %vm105_vm7, %v104_v15  ;;  %v341_v25 = vrot.slane %v340_v23, 1  ;;  %v348_v26 = vrot.slane %v347_v24, 1  ;;  %1162 = vmatprep.subr.bf16.mxu0 %v1161_v50  ;;  %v1177_v12 = vpack.c.bf16 %v407_v10, %v405_v9  ;;  %v1179_v14 = vpack.c.bf16 %v406_v13, %v404_v11  ;;  %v409_v15 = vld [vmem:[#allocation8 + $0xe8] sm:$0xff]  ;;  %v411_v16 = vld [vmem:[#allocation8 + $0xf8] sm:$0xff] }
  0x59   :  { %v408_v17 = vld [vmem:[#allocation8 + $0xe0] sm:$0xff]  ;;  %v1181_v18 = vpack.c.bf16 %v411_v16, %v409_v15  ;;  %v410_v19 = vld [vmem:[#allocation8 + $0xf0] sm:$0xff]  ;;  %v445_v42 = vld [vmem:[#allocation8 + $0x208] sm:$0xff] }
  0x5a   :  { %v342_v27 = vadd.f32 %v341_v25, %v340_v23  ;;  %v349_v28 = vadd.f32 %v348_v26, %v347_v24  ;;  %v1183_v20 = vpack.c.bf16 %v410_v19, %v408_v17  ;;  %v114_v23 = vld [vmem:[#allocation5 + $0x18] sm:$0xff]  ;;  %v115_v25 = vld [vmem:[#allocation5 + $0x20] sm:$0xff]  ;;  %v447_v43 = vld [vmem:[#allocation8 + $0x218] sm:$0xff] }
  0x5b   :  { %1164 = vmatpush1.bf16.msra.mxu0 %v1163_v51  ;;  %v111_v26 = vld [vmem:[#allocation5] sm:$0xff]  ;;  %v1217_v44 = vpack.c.bf16 %v447_v43, %v445_v42  ;;  %v444_v46 = vld [vmem:[#allocation8 + $0x200] sm:$0xff]  ;;  %v449_v48 = vld [vmem:[#allocation8 + $0x228] sm:$0xff] }
  0x5c   :  { %v353_v30 = vsel %vm352_vm8, %v349_v28, %v342_v27  ;;  %1166 = vmatprep.subr.bf16.mxu0 %v1165_v55  ;;  %v112_v27 = vld [vmem:[#allocation5 + $0x8] sm:$0xff]  ;;  %v446_v47 = vld [vmem:[#allocation8 + $0x210] sm:$0xff]  ;;  %v448_v52 = vld [vmem:[#allocation8 + $0x220] sm:$0xff] }
  0x5d   :  { %v355_v31 = vadd.f32 %v353_v30, %v332_v29  ;;  %v451_v49 = vld [vmem:[#allocation8 + $0x238] sm:$0xff]  ;;  %v1219_v50 = vpack.c.bf16 %v446_v47, %v444_v46  ;;  %v450_v53 = vld [vmem:[#allocation8 + $0x230] sm:$0xff]  ;;  %v453_v54 = vld [vmem:[#allocation8 + $0x248] sm:$0xff] }
  0x5e   :  { %v1221_v51 = vpack.c.bf16 %v451_v49, %v449_v48  ;;  %v455_v55 = vld [vmem:[#allocation8 + $0x258] sm:$0xff]  ;;  %v1223_v56 = vpack.c.bf16 %v450_v53, %v448_v52  ;;  %v454_v59 = vld [vmem:[#allocation8 + $0x250] sm:$0xff]  ;;  %v456_v63 = vld [vmem:[#allocation8 + $0x260] sm:$0xff] }
  0x5f   :  { %357 = vst.msk [vmem:[#allocation3] sm:$0x3] %vm92_vm0, %v355_v31  ;;  %1168 = vmatpush1.bf16.msra.mxu0 %v1167_v57  ;;  %v116_v31 = vld [vmem:[#allocation5 + $0x28] sm:$0xff]  ;;  %v137_v38 = vld [vmem:[#allocation4] sm:$0x1]  ;;  %v1225_v57 = vpack.c.bf16 %v455_v55, %v453_v54  ;;  %v460_v7 = vld [vmem:[#allocation8 + $0x280] sm:$0xff] }
  0x60   :  { %1170 = vmatprep.subr.bf16.mxu0 %v1169_v62  ;;  %v459_v60 = vld [vmem:[#allocation8 + $0x278] sm:$0xff]  ;;  %v461_v2 = vld [vmem:[#allocation8 + $0x288] sm:$0xff]  ;;  %v464_v13 = vld [vmem:[#allocation8 + $0x2a0] sm:$0xff] }
  0x61   :  { %v463_v3 = vld [vmem:[#allocation8 + $0x298] sm:$0xff]  ;;  %v465_v9 = vld [vmem:[#allocation8 + $0x2a8] sm:$0xff]  ;;  %v468_v19 = vld [vmem:[#allocation8 + $0x2c0] sm:$0xff] }
  0x62   :  { %v467_v10 = vld [vmem:[#allocation8 + $0x2b8] sm:$0xff]  ;;  %v469_v15 = vld [vmem:[#allocation8 + $0x2c8] sm:$0xff]  ;;  %v416_v43 = vld [vmem:[#allocation8 + $0x120] sm:$0xff] }
  0x63   :  { %1172 = vmatpush1.bf16.msra.mxu0 %v1171_v0  ;;  %v458_v0 = vld [vmem:[#allocation8 + $0x270] sm:$0xff]  ;;  %v471_v16 = vld [vmem:[#allocation8 + $0x2d8] sm:$0xff]  ;;  %v480_v48 = vld [vmem:[#allocation8 + $0x320] sm:$0xff] }
  0x64   :  { %1174 = vmatprep.subr.bf16.mxu0 %v1173_v6  ;;  %v1231_v5 = vpack.c.bf16 %v458_v0, %v456_v63  ;;  %v1233_v6 = vpack.c.bf16 %v463_v3, %v461_v2  ;;  %v483_v47 = vld [vmem:[#allocation8 + $0x338] sm:$0xff]  ;;  %v482_v49 = vld [vmem:[#allocation8 + $0x330] sm:$0xff]  ;;  %v421_v52 = vld [vmem:[#allocation8 + $0x148] sm:$0xff] }
  0x65   :  { %v423_v53 = vld [vmem:[#allocation8 + $0x158] sm:$0xff]  ;;  %v420_v55 = vld [vmem:[#allocation8 + $0x140] sm:$0xff]  ;;  %v425_v63 = vld [vmem:[#allocation8 + $0x168] sm:$0xff] }
  0x66   :  { %v361_v32 = vld [vmem:[#allocation3] sm:$0x3]  ;;  %v1193_v54 = vpack.c.bf16 %v423_v53, %v421_v52  ;;  %v427_v0 = vld [vmem:[#allocation8 + $0x178] sm:$0xff]  ;;  %v424_v3 = vld [vmem:[#allocation8 + $0x160] sm:$0xff] }
  0x67   :  { %v362_v35 = vmax.f32 %v361_v32, 1e-09  ;;  %1176 = vmatpush1.bf16.msra.mxu0 %v1175_v8  ;;  %v462_v8 = vld [vmem:[#allocation8 + $0x290] sm:$0xff]  ;;  %v1197_v2 = vpack.c.bf16 %v427_v0, %v425_v63  ;;  %v440_v52 = vld [vmem:[#allocation8 + $0x1e0] sm:$0xff]  ;;  %v1596_v0 = vmov 1983009808  }
  0x68   :  { %1178 = vmatprep.subr.bf16.mxu0 %v1177_v12  ;;  %v1235_v11 = vpack.c.bf16 %v462_v8, %v460_v7  ;;  %v1237_v12 = vpack.c.bf16 %v467_v10, %v465_v9  ;;  %v491_v8 = vld [vmem:[#allocation8 + $0x378] sm:$0xff]  ;;  %v488_v9 = vld [vmem:[#allocation8 + $0x360] sm:$0xff]  ;;  %v490_v10 = vld [vmem:[#allocation8 + $0x370] sm:$0xff] }
  0x69   :  { %1464 = vrcp.f32 %v362_v35  ;;  %v113_v35 = vld [vmem:[#allocation5 + $0x10] sm:$0xff]  ;;  %v442_v53 = vld [vmem:[#allocation8 + $0x1f0] sm:$0xff] }
  0x6b   :  { %1180 = vmatpush1.bf16.msra.mxu0 %v1179_v14  ;;  %v466_v14 = vld [vmem:[#allocation8 + $0x2b0] sm:$0xff] }
  0x6c   :  { %1182 = vmatprep.subr.bf16.mxu0 %v1181_v18  ;;  %v1239_v17 = vpack.c.bf16 %v466_v14, %v464_v13  ;;  %v1241_v18 = vpack.c.bf16 %v471_v16, %v469_v15  ;;  %v429_v13 = vld [vmem:[#allocation8 + $0x188] sm:$0xff]  ;;  %v431_v14 = vld [vmem:[#allocation8 + $0x198] sm:$0xff]  ;;  %v428_v16 = vld [vmem:[#allocation8 + $0x180] sm:$0xff] }
  0x6d   :  { %v1201_v15 = vpack.c.bf16 %v431_v14, %v429_v13 }
  0x6f   :  { %1184 = vmatpush1.bf16.msra.mxu0 %v1183_v20  ;;  %v470_v20 = vld [vmem:[#allocation8 + $0x2d0] sm:$0xff] }
  0x73   :  { %v1465_v58 = vpop.eup %1464 }
  0x74   :  { %368 = vperm.xlu1 %1463, %v1465_v58   ;;  %v452_v58 = vld [vmem:[#allocation8 + $0x240] sm:$0xff] }
  0x75   :  { %v1227_v61 = vpack.c.bf16 %v454_v59, %v452_v58  ;;  %v487_v59 = vld [vmem:[#allocation8 + $0x358] sm:$0xff] }
  0xce   :  { %v121_v21 = vpop.permute.xlu0 %120 }
  0xcf   :  { %vm125_vm9 = vcmp.eq.s32.totalorder %v121_v21, 1  ;;  %v473_v21 = vld [vmem:[#allocation8 + $0x2e8] sm:$0xff] }
  0xd0   :  { %vm1721_vm10 = vmpackc.low %vm125_vm9, %vm125_vm9 }
  0xd1   :  { %v129_v30 = vsel %vm1721_vm10, %v111_v26, 0  ;;  %v130_v34 = vsel %vm1721_vm10, %v112_v27, 0  ;;  %v131_v39 = vsel %vm1721_vm10, %v113_v35, 0  ;;  %v474_v26 = vld [vmem:[#allocation8 + $0x2f0] sm:$0xff]  ;;  %v479_v35 = vld [vmem:[#allocation8 + $0x318] sm:$0xff] }
  0xd2   :  { %v124_v22 = vpop.permute.xlu0 %123 }
  0xd3   :  { %vm126_vm11 = vcmp.eq.s32.totalorder %v124_v22, 1  ;;  %v475_v22 = vld [vmem:[#allocation8 + $0x2f8] sm:$0xff] }
  0xd4   :  { %vm128_vm12 = vmpackc.low %vm126_vm11, %vm126_vm11  ;;  %v1245_v24 = vpack.c.bf16 %v475_v22, %v473_v21  ;;  %v492_v21 = vld [vmem:[#allocation8 + $0x380] sm:$0xff]  ;;  %v494_v22 = vld [vmem:[#allocation8 + $0x390] sm:$0xff] }
  0xd5   :  { %v132_v28 = vsel %vm128_vm12, %v114_v23, 0  ;;  %v133_v29 = vsel %vm128_vm12, %v115_v25, 0  ;;  %v134_v37 = vsel %vm128_vm12, %v116_v31, 0  ;;  %v1243_v23 = vpack.c.bf16 %v470_v20, %v468_v19  ;;  %v472_v25 = vld [vmem:[#allocation8 + $0x2e0] sm:$0xff]  ;;  %v495_v20 = vld [vmem:[#allocation8 + $0x398] sm:$0xff] }
  0xd6   :  { %v1109_v32 = vcombine.high %v129_v30, %v132_v28  ;;  %v1108_v33 = vcombine.low %v129_v30, %v132_v28  ;;  %v1111_v36 = vcombine.high %v130_v34, %v133_v29  ;;  %v1110_v40 = vcombine.low %v130_v34, %v133_v29  ;;  %v413_v28 = vld [vmem:[#allocation8 + $0x108] sm:$0xff]  ;;  %v415_v29 = vld [vmem:[#allocation8 + $0x118] sm:$0xff]  ;;  %v412_v31 = vld [vmem:[#allocation8 + $0x100] sm:$0xff] }
  0xd7   :  { %v1113_v41 = vcombine.high %v131_v39, %v134_v37  ;;  %v1112_v45 = vcombine.low %v131_v39, %v134_v37  ;;  %v1247_v27 = vpack.c.bf16 %v474_v26, %v472_v25  ;;  %v1185_v30 = vpack.c.bf16 %v415_v29, %v413_v28  ;;  %v478_v37 = vld [vmem:[#allocation8 + $0x310] sm:$0xff]  ;;  %v433_v25 = vld [vmem:[#allocation8 + $0x1a8] sm:$0xff]  ;;  %v435_v26 = vld [vmem:[#allocation8 + $0x1b8] sm:$0xff] }
  0xd8   :  { %172 = vmatprep.subr.bf16.mxu1 %v1109_v32  ;;  %v414_v32 = vld [vmem:[#allocation8 + $0x110] sm:$0xff]  ;;  %v432_v28 = vld [vmem:[#allocation8 + $0x1a0] sm:$0xff] }
  0xd9   :  { %173 = vmatpush1.bf16.msra.mxu1 %v1108_v33  ;;  %v477_v33 = vld [vmem:[#allocation8 + $0x308] sm:$0xff]  ;;  %v1187_v34 = vpack.c.bf16 %v414_v32, %v412_v31  ;;  %1186 = vmatprep.subr.bf16.mxu0 %v1185_v30  ;;  %v434_v29 = vld [vmem:[#allocation8 + $0x1b0] sm:$0xff]  ;;  %v499_v32 = vld [vmem:[#allocation8 + $0x3b8] sm:$0xff] }
  0xda   :  { %213 = vmatprep.subr.bf16.mxu1 %v1111_v36  ;;  %v476_v36 = vld [vmem:[#allocation8 + $0x300] sm:$0xff]  ;;  %v497_v30 = vld [vmem:[#allocation8 + $0x3a8] sm:$0xff]  ;;  %v1207_v31 = vpack.c.bf16 %v434_v29, %v432_v28 }
  0xdb   :  { %v1251_v39 = vpack.c.bf16 %v478_v37, %v476_v36  ;;  %1188 = vmatpush1.bf16.msra.mxu0 %v1187_v34  ;;  %v498_v34 = vld [vmem:[#allocation8 + $0x3b0] sm:$0xff]  ;;  %v437_v37 = vld [vmem:[#allocation8 + $0x1c8] sm:$0xff] }
  0xdc   :  { %1114 = vmatmul.mubr.msk.bf16.vlgmr.msra.gmra.mrb[0].mxu1 %vm168_vm13, %v137_v38  ;;  %v136_v29 = vld [vmem:[#allocation2 + $0x8] sm:$0xf] }
  0xdd   :  { %214 = vmatpush1.bf16.msra.mxu1 %v1110_v40  ;;  %245 = vmatprep.mubr.bf16.mxu1 %v1594_v1  ;;  %v417_v40 = vld [vmem:[#allocation8 + $0x128] sm:$0xff] }
  0xde   :  { %254 = vmatprep.subr.bf16.mxu1 %v1113_v41  ;;  %v419_v41 = vld [vmem:[#allocation8 + $0x138] sm:$0xff] }
  0xdf   :  { %v1189_v42 = vpack.c.bf16 %v419_v41, %v417_v40  ;;  %v436_v40 = vld [vmem:[#allocation8 + $0x1c0] sm:$0xff]  ;;  %v438_v41 = vld [vmem:[#allocation8 + $0x1d0] sm:$0xff] }
  0xe1   :  { %1190 = vmatprep.subr.bf16.mxu0 %v1189_v42  ;;  %v501_v42 = vld [vmem:[#allocation8 + $0x3c8] sm:$0xff] }
  0xe4   :  { %1115 = vmatmul.mubr.msk.bf16.vlgmr.msra.gmra.mrb[4].mxu1 %vm168_vm13, %v137_v38 }
  0xe5   :  { %255 = vmatpush1.bf16.msra.mxu1 %v1112_v45  ;;  %286 = vmatprep.mubr.bf16.mxu1 %v1594_v1  ;;  %v457_v1 = vld [vmem:[#allocation8 + $0x268] sm:$0xff] }
  0xe6   :  { %1218 = vmatprep.subr.bf16.mxu1 %v1217_v44  ;;  %v1229_v62 = vpack.c.bf16 %v459_v60, %v457_v1  ;;  %v418_v44 = vld [vmem:[#allocation8 + $0x130] sm:$0xff]  ;;  %v481_v45 = vld [vmem:[#allocation8 + $0x328] sm:$0xff]  ;;  %v484_v1 = vld [vmem:[#allocation8 + $0x340] sm:$0xff] }
  0xe7   :  { %v1191_v46 = vpack.c.bf16 %v418_v44, %v416_v43  ;;  %v486_v60 = vld [vmem:[#allocation8 + $0x350] sm:$0xff]  ;;  %v1211_v43 = vpack.c.bf16 %v438_v41, %v436_v40  ;;  %v503_v44 = vld [vmem:[#allocation8 + $0x3d8] sm:$0xff] }
  0xe8   :  { %v515_v40 = vld [vmem:[#allocation8 + $0x438] sm:$0xff] }
  0xe9   :  { %1192 = vmatpush1.bf16.msra.mxu0 %v1191_v46  ;;  %v502_v46 = vld [vmem:[#allocation8 + $0x3d0] sm:$0xff] }
  0xea   :  { %1194 = vmatprep.subr.bf16.mxu0 %v1193_v54  ;;  %v505_v54 = vld [vmem:[#allocation8 + $0x3e8] sm:$0xff] }
  0xec   :  { %1116 = vmatmul.mubr.msk.bf16.vlgmr.msra.gmra.mrb[8].mxu1 %vm168_vm13, %v137_v38  ;;  %v1249_v38 = vpack.c.bf16 %v479_v35, %v477_v33  ;;  %v496_v33 = vld [vmem:[#allocation8 + $0x3a0] sm:$0xff]  ;;  %v1269_v35 = vpack.c.bf16 %v499_v32, %v497_v30 }
  0xed   :  { %1220 = vmatpush1.bf16.msra.mxu1 %v1219_v50  ;;  %v1253_v50 = vpack.c.bf16 %v483_v47, %v481_v45  ;;  %v1271_v36 = vpack.c.bf16 %v498_v34, %v496_v33  ;;  %v500_v45 = vld [vmem:[#allocation8 + $0x3c0] sm:$0xff]  ;;  %v1273_v47 = vpack.c.bf16 %v503_v44, %v501_v42 }
  0xee   :  { %1222 = vmatprep.subr.bf16.mxu1 %v1221_v51  ;;  %v1255_v51 = vpack.c.bf16 %v482_v49, %v480_v48  ;;  %v1275_v48 = vpack.c.bf16 %v502_v46, %v500_v45  ;;  %v441_v49 = vld [vmem:[#allocation8 + $0x1e8] sm:$0xff]  ;;  %v508_v34 = vld [vmem:[#allocation8 + $0x400] sm:$0xff]  ;;  %v514_v45 = vld [vmem:[#allocation8 + $0x430] sm:$0xff] }
  0xef   :  { %v512_v44 = vld [vmem:[#allocation8 + $0x420] sm:$0xff]  ;;  %v517_v46 = vld [vmem:[#allocation8 + $0x448] sm:$0xff] }
  0xf1   :  { %1224 = vmatpush1.bf16.msra.mxu1 %v1223_v56  ;;  %v422_v56 = vld [vmem:[#allocation8 + $0x150] sm:$0xff] }
  0xf2   :  { %1226 = vmatprep.subr.bf16.mxu1 %v1225_v57  ;;  %v485_v57 = vld [vmem:[#allocation8 + $0x348] sm:$0xff]  ;;  %v1195_v58 = vpack.c.bf16 %v422_v56, %v420_v55  ;;  %v1215_v55 = vpack.c.bf16 %v442_v53, %v440_v52  ;;  %v507_v56 = vld [vmem:[#allocation8 + $0x3f8] sm:$0xff] }
  0xf3   :  { %v521_v52 = vld [vmem:[#allocation8 + $0x468] sm:$0xff]  ;;  %v523_v53 = vld [vmem:[#allocation8 + $0x478] sm:$0xff] }
  0xf4   :  { %1196 = vmatpush1.bf16.msra.mxu0 %v1195_v58  ;;  %v506_v58 = vld [vmem:[#allocation8 + $0x3f0] sm:$0xff] }
  0xf5   :  { %1228 = vmatpush1.bf16.msra.mxu1 %v1227_v61  ;;  %v1257_v61 = vpack.c.bf16 %v487_v59, %v485_v57  ;;  %1198 = vmatprep.subr.bf16.mxu0 %v1197_v2  ;;  %v504_v57 = vld [vmem:[#allocation8 + $0x3e0] sm:$0xff]  ;;  %v1277_v59 = vpack.c.bf16 %v507_v56, %v505_v54  ;;  %v304_v2 = vunpack.c.l.s4 %v1596_v0 }
  0xf6   :  { %1230 = vmatprep.subr.bf16.mxu1 %v1229_v62  ;;  %v1259_v62 = vpack.c.bf16 %v486_v60, %v484_v1  ;;  %v1279_v1 = vpack.c.bf16 %v506_v58, %v504_v57  ;;  %v509_v60 = vld [vmem:[#allocation8 + $0x408] sm:$0xff]  ;;  %v1293_v57 = vpack.c.bf16 %v523_v53, %v521_v52  ;;  %v520_v58 = vld [vmem:[#allocation8 + $0x460] sm:$0xff]  ;;  %v558_v52 = vld [vmem:[#allocation8 + $0x590] sm:$0xff] }
  0xf7   :  { %v561_v53 = vld [vmem:[#allocation8 + $0x5a8] sm:$0xff] }
  0xf9   :  { %1232 = vmatpush1.bf16.msra.mxu1 %v1231_v5  ;;  %v426_v5 = vld [vmem:[#allocation8 + $0x170] sm:$0xff] }
  0xfa   :  { %1234 = vmatprep.subr.bf16.mxu1 %v1233_v6  ;;  %v489_v6 = vld [vmem:[#allocation8 + $0x368] sm:$0xff]  ;;  %v1199_v7 = vpack.c.bf16 %v426_v5, %v424_v3 }
  0xfc   :  { %1200 = vmatpush1.bf16.msra.mxu0 %v1199_v7  ;;  %v1597_v7 = vmov 269488144  }
  0xfd   :  { %1236 = vmatpush1.bf16.msra.mxu1 %v1235_v11  ;;  %v1261_v11 = vpack.c.bf16 %v491_v8, %v489_v6  ;;  %1202 = vmatprep.subr.bf16.mxu0 %v1201_v15  ;;  %v371_v8 = vunpack.c.l.s4 %v1597_v7 }
  0xfe   :  { %1238 = vmatprep.subr.bf16.mxu1 %v1237_v12  ;;  %v1263_v12 = vpack.c.bf16 %v490_v10, %v488_v9  ;;  %v305_v10 = vunpack.c.0.s8 %v304_v2  ;;  %v524_v2 = vld [vmem:[#allocation8 + $0x480] sm:$0xff] }
 0x101   :  { %1240 = vmatpush1.bf16.msra.mxu1 %v1239_v17  ;;  %v430_v17 = vld [vmem:[#allocation8 + $0x190] sm:$0xff] }
 0x102   :  { %1242 = vmatprep.subr.bf16.mxu1 %v1241_v18  ;;  %v493_v18 = vld [vmem:[#allocation8 + $0x388] sm:$0xff]  ;;  %v1203_v19 = vpack.c.bf16 %v430_v17, %v428_v16 }
 0x104   :  { %1204 = vmatpush1.bf16.msra.mxu0 %v1203_v19  ;;  %v369_v19 = vpop.permute.xlu1 %368 }
 0x105   :  { %1244 = vmatpush1.bf16.msra.mxu1 %v1243_v23  ;;  %v1265_v23 = vpack.c.bf16 %v495_v20, %v493_v18 }
 0x106   :  { %1246 = vmatprep.subr.bf16.mxu1 %v1245_v24  ;;  %v1267_v24 = vpack.c.bf16 %v494_v22, %v492_v21 }
 0x109   :  { %1248 = vmatpush1.bf16.msra.mxu1 %v1247_v27  ;;  %v1205_v27 = vpack.c.bf16 %v435_v26, %v433_v25 }
 0x10a   :  { %1250 = vmatprep.subr.bf16.mxu1 %v1249_v38  ;;  %v439_v38 = vld [vmem:[#allocation8 + $0x1d8] sm:$0xff] }
 0x10b   :  { %1206 = vmatprep.subr.bf16.mxu0 %v1205_v27 }
 0x10c   :  { %1208 = vmatpush1.bf16.msra.mxu0 %v1207_v31 }
 0x10d   :  { %1252 = vmatpush1.bf16.msra.mxu1 %v1251_v39  ;;  %v1209_v39 = vpack.c.bf16 %v439_v38, %v437_v37 }
 0x10e   :  { %1254 = vmatprep.subr.bf16.mxu1 %v1253_v50  ;;  %v443_v50 = vld [vmem:[#allocation8 + $0x1f8] sm:$0xff] }
 0x10f   :  { %1210 = vmatprep.subr.bf16.mxu0 %v1209_v39  ;;  %v513_v39 = vld [vmem:[#allocation8 + $0x428] sm:$0xff] }
 0x110   :  { %1212 = vmatpush1.bf16.msra.mxu0 %v1211_v43  ;;  %v1285_v43 = vpack.c.bf16 %v515_v40, %v513_v39  ;;  %v548_v39 = vld [vmem:[#allocation8 + $0x540] sm:$0xff]  ;;  %v550_v40 = vld [vmem:[#allocation8 + $0x550] sm:$0xff] }
 0x111   :  { %1256 = vmatpush1.bf16.msra.mxu1 %v1255_v51  ;;  %v1213_v51 = vpack.c.bf16 %v443_v50, %v441_v49  ;;  %v516_v50 = vld [vmem:[#allocation8 + $0x440] sm:$0xff] }
 0x112   :  { %1258 = vmatprep.subr.bf16.mxu1 %v1257_v61  ;;  %v511_v61 = vld [vmem:[#allocation8 + $0x418] sm:$0xff] }
 0x113   :  { %1214 = vmatprep.subr.bf16.mxu0 %v1213_v51  ;;  %v518_v51 = vld [vmem:[#allocation8 + $0x450] sm:$0xff] }
 0x114   :  { %1216 = vmatpush1.bf16.msra.mxu0 %v1215_v55  ;;  %v1291_v56 = vpack.c.bf16 %v518_v51, %v516_v50  ;;  %v556_v51 = vld [vmem:[#allocation8 + $0x580] sm:$0xff] }
 0x115   :  { %1260 = vmatpush1.bf16.msra.mxu1 %v1259_v62  ;;  %v1281_v62 = vpack.c.bf16 %v511_v61, %v509_v60  ;;  %v525_v60 = vld [vmem:[#allocation8 + $0x488] sm:$0xff]  ;;  %v527_v61 = vld [vmem:[#allocation8 + $0x498] sm:$0xff] }
 0x116   :  { %1262 = vmatprep.subr.bf16.mxu1 %v1261_v11  ;;  %v372_v11 = vunpack.c.0.s8 %v371_v8  ;;  %v1297_v0 = vpack.c.bf16 %v527_v61, %v525_v60  ;;  %v567_v60 = vld [vmem:[#allocation8 + $0x5d8] sm:$0xff] }
 0x118   :  { %v375_v17 = vsub.s32 %v372_v11, %v1708_v4  ;;  %v533_v11 = vld [vmem:[#allocation8 + $0x4c8] sm:$0xff] }
 0x119   :  { %1264 = vmatpush1.bf16.msra.mxu1 %v1263_v12  ;;  %v308_v12 = vsub.s32 %v305_v10, %v1708_v4  ;;  %v530_v10 = vld [vmem:[#allocation8 + $0x4b0] sm:$0xff] }
 0x11a   :  { %1266 = vmatprep.subr.bf16.mxu1 %v1265_v23  ;;  %v376_v23 = vrot.slane %v369_v19, %v375_v17  ;;  %v537_v17 = vld [vmem:[#allocation8 + $0x4e8] sm:$0xff] }
 0x11d   :  { %1268 = vmatpush1.bf16.msra.mxu1 %v1267_v24 }
 0x11e   :  { %1270 = vmatprep.subr.bf16.mxu1 %v1269_v35  ;;  %v510_v35 = vld [vmem:[#allocation8 + $0x410] sm:$0xff] }
 0x11f   :  { %v1283_v42 = vpack.c.bf16 %v510_v35, %v508_v34  ;;  %v546_v34 = vld [vmem:[#allocation8 + $0x530] sm:$0xff]  ;;  %v549_v35 = vld [vmem:[#allocation8 + $0x548] sm:$0xff] }
 0x121   :  { %1272 = vmatpush1.bf16.msra.mxu1 %v1271_v36 }
 0x122   :  { %1274 = vmatprep.subr.bf16.mxu1 %v1273_v47  ;;  %v519_v47 = vld [vmem:[#allocation8 + $0x458] sm:$0xff] }
 0x123   :  { %v1289_v49 = vpack.c.bf16 %v519_v47, %v517_v46  ;;  %v554_v46 = vld [vmem:[#allocation8 + $0x570] sm:$0xff]  ;;  %v557_v47 = vld [vmem:[#allocation8 + $0x588] sm:$0xff] }
 0x125   :  { %1276 = vmatpush1.bf16.msra.mxu1 %v1275_v48  ;;  %v1287_v48 = vpack.c.bf16 %v514_v45, %v512_v44  ;;  %v552_v45 = vld [vmem:[#allocation8 + $0x560] sm:$0xff] }
 0x126   :  { %1278 = vmatprep.subr.bf16.mxu1 %v1277_v59  ;;  %v522_v59 = vld [vmem:[#allocation8 + $0x470] sm:$0xff] }
 0x129   :  { %1280 = vmatpush1.bf16.msra.mxu1 %v1279_v1 }
 0x12a   :  { %1282 = vmatprep.subr.bf16.mxu1 %v1281_v62 }
 0x1af   :  { %v206_v63 = vpop.f32.mrb[0].mxu1 }
 0x1b0   :  { %v208_v3 = vpop.f32.mrb[1].mxu1 }
 0x1b1   :  { %v301_v5 = vcombine.low %v206_v63, %v208_v3  ;;  %v210_v6 = vpop.f32.mrb[2].mxu1  ;;  %v1295_v63 = vpack.c.bf16 %v522_v59, %v520_v58  ;;  %v526_v3 = vld [vmem:[#allocation8 + $0x490] sm:$0xff]  ;;  %v565_v59 = vld [vmem:[#allocation8 + $0x5c8] sm:$0xff] }
 0x1b2   :  { %v211_v9 = vpop.f32.mrb[3].mxu1  ;;  %v531_v6 = vld [vmem:[#allocation8 + $0x4b8] sm:$0xff]  ;;  %v1299_v7 = vpack.c.bf16 %v526_v3, %v524_v2  ;;  %v562_v58 = vld [vmem:[#allocation8 + $0x5b0] sm:$0xff]  ;;  %v569_v2 = vld [vmem:[#allocation8 + $0x5e8] sm:$0xff] }
 0x1b3   :  { %v309_v20 = vrot.slane %v301_v5, %v308_v12  ;;  %v529_v5 = vld [vmem:[#allocation8 + $0x4a8] sm:$0xff]  ;;  %v528_v9 = vld [vmem:[#allocation8 + $0x4a0] sm:$0xff]  ;;  %v571_v3 = vld [vmem:[#allocation8 + $0x5f8] sm:$0xff] }
 0x1b4   :  { %v1301_v8 = vpack.c.bf16 %v531_v6, %v529_v5  ;;  %v1341_v6 = vpack.c.bf16 %v571_v3, %v569_v2  ;;  %v868_v3 = vld [vmem:[#allocation10 + $0x120] sm:$0xff] }
 0x1b7   :  { %v247_v13 = vpop.f32.mrb[4].mxu1 }
 0x1b8   :  { %v249_v14 = vpop.f32.mrb[5].mxu1 }
 0x1b9   :  { %v302_v15 = vcombine.low %v247_v13, %v249_v14  ;;  %v251_v16 = vpop.f32.mrb[6].mxu1  ;;  %v1303_v13 = vpack.c.bf16 %v530_v10, %v528_v9  ;;  %v833_v10 = vld [vmem:[#allocation10 + $0x8] sm:$0xff] }
 0x1ba   :  { %v252_v18 = vpop.f32.mrb[7].mxu1  ;;  %v534_v16 = vld [vmem:[#allocation8 + $0x4d0] sm:$0xff] }
 0x1bb   :  { %v316_v21 = vrot.slane %v302_v15, %v308_v12  ;;  %v532_v15 = vld [vmem:[#allocation8 + $0x4c0] sm:$0xff]  ;;  %v539_v18 = vld [vmem:[#allocation8 + $0x4f8] sm:$0xff] }
 0x1bc   :  { %v1307_v19 = vpack.c.bf16 %v534_v16, %v532_v15  ;;  %v837_v15 = vld [vmem:[#allocation10 + $0x28] sm:$0xff]  ;;  %v839_v16 = vld [vmem:[#allocation10 + $0x38] sm:$0xff] }
 0x1bd   :  { %v317_v22 = vcombine.low %v309_v20, %v316_v21  ;;  %v1309_v20 = vpack.c.bf16 %v539_v18, %v537_v17  ;;  %v536_v21 = vld [vmem:[#allocation8 + $0x4e0] sm:$0xff]  ;;  %v1349_v18 = vpack.c.bf16 %v839_v16, %v837_v15 }
 0x1be   :  { %v876_v16 = vld [vmem:[#allocation10 + $0x160] sm:$0xff] }
 0x1bf   :  { %v288_v24 = vpop.f32.mrb[8].mxu1  ;;  %v378_v27 = vmul.f32 %v376_v23, %v317_v22  ;;  %v538_v22 = vld [vmem:[#allocation8 + $0x4f0] sm:$0xff] }
 0x1c0   :  { %v290_v25 = vpop.f32.mrb[9].mxu1 }
 0x1c1   :  { %v318_v26 = vcombine.low %v288_v24, %v290_v25  ;;  %v292_v28 = vpop.f32.mrb[10].mxu1  ;;  %v586_v32 = vcombine.high %v378_v27, %v378_v27  ;;  %v593_v33 = vrot.slane %v378_v27, %v308_v12  ;;  %v543_v24 = vld [vmem:[#allocation8 + $0x518] sm:$0xff]  ;;  %v1311_v25 = vpack.c.bf16 %v538_v22, %v536_v21  ;;  %v540_v27 = vld [vmem:[#allocation8 + $0x500] sm:$0xff]  ;;  %v841_v21 = vld [vmem:[#allocation10 + $0x48] sm:$0xff] }
 0x1c2   :  { %v293_v30 = vpop.f32.mrb[11].mxu1  ;;  %v542_v28 = vld [vmem:[#allocation8 + $0x510] sm:$0xff]  ;;  %v843_v22 = vld [vmem:[#allocation10 + $0x58] sm:$0xff] }
 0x1c3   :  { %v325_v31 = vrot.slane %v318_v26, %v308_v12  ;;  %v601_v37 = vcombine.high %v593_v33, %v593_v33  ;;  %v600_v38 = vrot.slane %v586_v32, %v308_v12  ;;  %v547_v30 = vld [vmem:[#allocation8 + $0x538] sm:$0xff] }
 0x1c5   :  { %v329_v36 = vadd.f32 %v325_v31, %v136_v29  ;;  %681 = vmatprep.mubr.f32.mxu0 %v601_v37  ;;  %v602_v41 = vcombine.high %v600_v38, %v600_v38  ;;  %v545_v29 = vld [vmem:[#allocation8 + $0x528] sm:$0xff]  ;;  %v1315_v31 = vpack.c.bf16 %v542_v28, %v540_v27  ;;  %v847_v27 = vld [vmem:[#allocation10 + $0x78] sm:$0xff] }
 0x1c6   :  { %682 = vmatmul.mubr.f32.vlgmr.msra.gmra.mrb[0].mxu0 %v593_v33  ;;  %v1317_v32 = vpack.c.bf16 %v547_v30, %v545_v29  ;;  %v544_v33 = vld [vmem:[#allocation8 + $0x520] sm:$0xff] }
 0x1c7   :  { %331 = vst [vmem:[#allocation2 + $0x8] sm:$0xf] %v329_v36  ;;  %752 = vmatprep.mubr.f32.mxu1 %v602_v41  ;;  %v551_v36 = vld [vmem:[#allocation8 + $0x558] sm:$0xff]  ;;  %v1319_v37 = vpack.c.bf16 %v546_v34, %v544_v33  ;;  %v553_v41 = vld [vmem:[#allocation8 + $0x568] sm:$0xff]  ;;  %v844_v30 = vld [vmem:[#allocation10 + $0x60] sm:$0xff] }
 0x1c8   :  { %753 = vmatmul.mubr.f32.vlgmr.msra.gmra.mrb[12].mxu1 %v600_v38  ;;  %v1321_v38 = vpack.c.bf16 %v551_v36, %v549_v35  ;;  %v851_v33 = vld [vmem:[#allocation10 + $0x98] sm:$0xff]  ;;  %v848_v36 = vld [vmem:[#allocation10 + $0x80] sm:$0xff] }
 0x1c9   :  { %1284 = vmatpush1.bf16.msra.mxu1 %v1283_v42  ;;  %v555_v42 = vld [vmem:[#allocation8 + $0x578] sm:$0xff] }
 0x1ca   :  { %1286 = vmatprep.subr.bf16.mxu1 %v1285_v43  ;;  %v1323_v43 = vpack.c.bf16 %v550_v40, %v548_v39  ;;  %v1325_v44 = vpack.c.bf16 %v555_v42, %v553_v41  ;;  %v855_v39 = vld [vmem:[#allocation10 + $0xb8] sm:$0xff]  ;;  %v852_v42 = vld [vmem:[#allocation10 + $0xa0] sm:$0xff] }
 0x1cd   :  { %1288 = vmatpush1.bf16.msra.mxu1 %v1287_v48  ;;  %v559_v48 = vld [vmem:[#allocation8 + $0x598] sm:$0xff] }
 0x1ce   :  { %v364_v54 = vld [vmem:[#allocation2 + $0x8] sm:$0xf]  ;;  %1290 = vmatprep.subr.bf16.mxu1 %v1289_v49  ;;  %v1327_v49 = vpack.c.bf16 %v554_v46, %v552_v45  ;;  %v1329_v50 = vpack.c.bf16 %v559_v48, %v557_v47  ;;  %v859_v45 = vld [vmem:[#allocation10 + $0xd8] sm:$0xff]  ;;  %v856_v48 = vld [vmem:[#allocation10 + $0xc0] sm:$0xff] }
 0x1cf   :  { %v379_v55 = vmul.f32 %v376_v23, %v364_v54  ;;  %v541_v23 = vld [vmem:[#allocation8 + $0x508] sm:$0xff]  ;;  %v563_v54 = vld [vmem:[#allocation8 + $0x5b8] sm:$0xff] }
 0x1d0   :  { %v1313_v26 = vpack.c.bf16 %v543_v24, %v541_v23  ;;  %v1353_v24 = vpack.c.bf16 %v843_v22, %v841_v21  ;;  %v880_v22 = vld [vmem:[#allocation10 + $0x180] sm:$0xff] }
 0x1d1   :  { %v1738_v1 = vrot.slane %v379_v55, %v308_v12  ;;  %1292 = vmatpush1.bf16.msra.mxu1 %v1291_v56  ;;  %v535_v12 = vld [vmem:[#allocation8 + $0x4d8] sm:$0xff]  ;;  %v1331_v55 = vpack.c.bf16 %v558_v52, %v556_v51  ;;  %v1333_v56 = vpack.c.bf16 %v563_v54, %v561_v53  ;;  %v860_v54 = vld [vmem:[#allocation10 + $0xe0] sm:$0xff] }
 0x1d2   :  { %1294 = vmatprep.subr.bf16.mxu1 %v1293_v57  ;;  %v1305_v14 = vpack.c.bf16 %v535_v12, %v533_v11  ;;  %v560_v57 = vld [vmem:[#allocation8 + $0x5a0] sm:$0xff]  ;;  %v835_v11 = vld [vmem:[#allocation10 + $0x18] sm:$0xff] }
 0x1d3   :  { %v610_v62 = vcombine.high %v1738_v1, %v1738_v1  ;;  %v1335_v61 = vpack.c.bf16 %v562_v58, %v560_v57  ;;  %v832_v12 = vld [vmem:[#allocation10] sm:$0xff]  ;;  %v863_v51 = vld [vmem:[#allocation10 + $0xf8] sm:$0xff] }
 0x1d4   :  { %v867_v57 = vld [vmem:[#allocation10 + $0x118] sm:$0xff] }
 0x1d5   :  { %823 = vmatprep.mubr.f32.mxu1 %v610_v62  ;;  %1296 = vmatpush1.bf16.msra.mxu1 %v1295_v63  ;;  %v1337_v62 = vpack.c.bf16 %v567_v60, %v565_v59  ;;  %v564_v63 = vld [vmem:[#allocation8 + $0x5c0] sm:$0xff] }
 0x1d6   :  { %1298 = vmatprep.subr.bf16.mxu1 %v1297_v0  ;;  %v566_v0 = vld [vmem:[#allocation8 + $0x5d0] sm:$0xff]  ;;  %v864_v60 = vld [vmem:[#allocation10 + $0x100] sm:$0xff] }
 0x1d7   :  { %v1339_v5 = vpack.c.bf16 %v566_v0, %v564_v63  ;;  %v871_v63 = vld [vmem:[#allocation10 + $0x138] sm:$0xff] }
 0x1d9   :  { %1300 = vmatpush1.bf16.msra.mxu1 %v1299_v7  ;;  %v568_v7 = vld [vmem:[#allocation8 + $0x5e0] sm:$0xff] }
 0x1da   :  { %1302 = vmatprep.subr.bf16.mxu1 %v1301_v8  ;;  %v570_v8 = vld [vmem:[#allocation8 + $0x5f0] sm:$0xff] }
 0x1db   :  { %v1343_v9 = vpack.c.bf16 %v570_v8, %v568_v7  ;;  %v875_v7 = vld [vmem:[#allocation10 + $0x158] sm:$0xff] }
 0x1dd   :  { %1304 = vmatpush1.bf16.msra.mxu1 %v1303_v13  ;;  %v1345_v13 = vpack.c.bf16 %v835_v11, %v833_v10  ;;  %v872_v10 = vld [vmem:[#allocation10 + $0x140] sm:$0xff]  ;;  %v874_v11 = vld [vmem:[#allocation10 + $0x150] sm:$0xff] }
 0x1de   :  { %1306 = vmatprep.subr.bf16.mxu1 %v1305_v14  ;;  %v834_v14 = vld [vmem:[#allocation10 + $0x10] sm:$0xff] }
 0x1df   :  { %v1347_v17 = vpack.c.bf16 %v834_v14, %v832_v12  ;;  %1346 = vmatprep.subr.bf16.mxu0 %v1345_v13  ;;  %v877_v12 = vld [vmem:[#allocation10 + $0x168] sm:$0xff]  ;;  %v879_v13 = vld [vmem:[#allocation10 + $0x178] sm:$0xff]  ;;  %v1387_v14 = vpack.c.bf16 %v874_v11, %v872_v10  ;;  %v985_v10 = vld [vmem:[#allocation11 + $0x20] sm:$0xff] }
 0x1e0   :  { %v1389_v15 = vpack.c.bf16 %v879_v13, %v877_v12  ;;  %v986_v11 = vld [vmem:[#allocation11 + $0x28] sm:$0xff]  ;;  %v1003_v12 = vld [vmem:[#allocation11 + $0xb0] sm:$0xff]  ;;  %v1004_v13 = vld [vmem:[#allocation11 + $0xb8] sm:$0xff] }
 0x1e1   :  { %1308 = vmatpush1.bf16.msra.mxu1 %v1307_v19  ;;  %v836_v19 = vld [vmem:[#allocation10 + $0x20] sm:$0xff]  ;;  %1348 = vmatpush1.bf16.msra.mxu0 %v1347_v17  ;;  %v878_v17 = vld [vmem:[#allocation10 + $0x170] sm:$0xff] }
 0x1e2   :  { %1310 = vmatprep.subr.bf16.mxu1 %v1309_v20  ;;  %v838_v20 = vld [vmem:[#allocation10 + $0x30] sm:$0xff]  ;;  %1350 = vmatprep.subr.bf16.mxu0 %v1349_v18  ;;  %v881_v18 = vld [vmem:[#allocation10 + $0x188] sm:$0xff] }
 0x1e3   :  { %v1351_v23 = vpack.c.bf16 %v838_v20, %v836_v19  ;;  %v883_v19 = vld [vmem:[#allocation10 + $0x198] sm:$0xff]  ;;  %v1391_v20 = vpack.c.bf16 %v878_v17, %v876_v16  ;;  %v987_v16 = vld [vmem:[#allocation11 + $0x30] sm:$0xff] }
 0x1e4   :  { %v1393_v21 = vpack.c.bf16 %v883_v19, %v881_v18  ;;  %v988_v17 = vld [vmem:[#allocation11 + $0x38] sm:$0xff]  ;;  %v1005_v18 = vld [vmem:[#allocation11 + $0xc0] sm:$0xff]  ;;  %v1006_v19 = vld [vmem:[#allocation11 + $0xc8] sm:$0xff] }
 0x1e5   :  { %1312 = vmatpush1.bf16.msra.mxu1 %v1311_v25  ;;  %v840_v25 = vld [vmem:[#allocation10 + $0x40] sm:$0xff]  ;;  %1352 = vmatpush1.bf16.msra.mxu0 %v1351_v23  ;;  %v882_v23 = vld [vmem:[#allocation10 + $0x190] sm:$0xff] }
 0x1e6   :  { %1314 = vmatprep.subr.bf16.mxu1 %v1313_v26  ;;  %v845_v26 = vld [vmem:[#allocation10 + $0x68] sm:$0xff]  ;;  %1354 = vmatprep.subr.bf16.mxu0 %v1353_v24 }
 0x1e7   :  { %v1357_v29 = vpack.c.bf16 %v847_v27, %v845_v26  ;;  %v885_v24 = vld [vmem:[#allocation10 + $0x1a8] sm:$0xff]  ;;  %v884_v27 = vld [vmem:[#allocation10 + $0x1a0] sm:$0xff] }
 0x1e9   :  { %1316 = vmatpush1.bf16.msra.mxu1 %v1315_v31  ;;  %v846_v31 = vld [vmem:[#allocation10 + $0x70] sm:$0xff] }
 0x1ea   :  { %1318 = vmatprep.subr.bf16.mxu1 %v1317_v32  ;;  %v849_v32 = vld [vmem:[#allocation10 + $0x88] sm:$0xff]  ;;  %v1359_v34 = vpack.c.bf16 %v846_v31, %v844_v30  ;;  %v891_v30 = vld [vmem:[#allocation10 + $0x1d8] sm:$0xff] }
 0x1eb   :  { %v1361_v35 = vpack.c.bf16 %v851_v33, %v849_v32  ;;  %v888_v33 = vld [vmem:[#allocation10 + $0x1c0] sm:$0xff] }
 0x1ed   :  { %1320 = vmatpush1.bf16.msra.mxu1 %v1319_v37  ;;  %v850_v37 = vld [vmem:[#allocation10 + $0x90] sm:$0xff] }
 0x1ee   :  { %1322 = vmatprep.subr.bf16.mxu1 %v1321_v38  ;;  %v853_v38 = vld [vmem:[#allocation10 + $0xa8] sm:$0xff]  ;;  %v1363_v40 = vpack.c.bf16 %v850_v37, %v848_v36  ;;  %v895_v37 = vld [vmem:[#allocation10 + $0x1f8] sm:$0xff] }
 0x1ef   :  { %v1365_v41 = vpack.c.bf16 %v855_v39, %v853_v38  ;;  %v893_v36 = vld [vmem:[#allocation10 + $0x1e8] sm:$0xff]  ;;  %v892_v39 = vld [vmem:[#allocation10 + $0x1e0] sm:$0xff] }
 0x1f0   :  { %v1405_v38 = vpack.c.bf16 %v895_v37, %v893_v36  ;;  %v1011_v36 = vld [vmem:[#allocation11 + $0xf0] sm:$0xff]  ;;  %v1012_v37 = vld [vmem:[#allocation11 + $0xf8] sm:$0xff] }
 0x1f1   :  { %1324 = vmatpush1.bf16.msra.mxu1 %v1323_v43  ;;  %v854_v43 = vld [vmem:[#allocation10 + $0xb0] sm:$0xff] }
 0x1f2   :  { %1326 = vmatprep.subr.bf16.mxu1 %v1325_v44  ;;  %v857_v44 = vld [vmem:[#allocation10 + $0xc8] sm:$0xff]  ;;  %v1367_v46 = vpack.c.bf16 %v854_v43, %v852_v42  ;;  %v997_v42 = vld [vmem:[#allocation11 + $0x80] sm:$0xff] }
 0x1f3   :  { %v1369_v47 = vpack.c.bf16 %v859_v45, %v857_v44  ;;  %v998_v43 = vld [vmem:[#allocation11 + $0x88] sm:$0xff] }
 0x1f4   :  { %v1409_v44 = vpack.c.bf16 %v998_v43, %v997_v42  ;;  %v896_v42 = vld [vmem:[%s1779_s5] sm:$0x3]  ;;  %s1598_s5 = smov [#allocation13]  }
 0x1f5   :  { %1328 = vmatpush1.bf16.msra.mxu1 %v1327_v49  ;;  %v858_v49 = vld [vmem:[#allocation10 + $0xd0] sm:$0xff]  ;;  %s1097_s21 = sshll.u32 %s1598_s5, 4  ;;  %s1098_s21 = int_to_ptr.vmem [resolvable:$true] %s1097_s21 }
 0x1f6   :  { %1330 = vmatprep.subr.bf16.mxu1 %v1329_v50  ;;  %v861_v50 = vld [vmem:[#allocation10 + $0xe8] sm:$0xff]  ;;  %v1371_v52 = vpack.c.bf16 %v858_v49, %v856_v48  ;;  %v572_v48 = vld [vmem:[%s1777_s3] sm:$0x3]  ;;  %v580_v49 = vsub.s32 1, %v1708_v4  ;;  %s1554_s22 = scalar_lea.vmem %s1098_s21, 32  ;;  %p1559_p5 = scmp.lt.s32.totalorder %s1098_s21, %s1098_s21 }
 0x1f7   :  { %v1373_v53 = vpack.c.bf16 %v863_v51, %v861_v50  ;;  %p1555_p4 = scmp.ne.s32.totalorder %s1098_s21, %s1554_s22  ;;  %p1560_p6 = scmp.lt.s32.totalorder %s1554_s22, %s1554_s22 }
 0x1f8   :  { %v581_v51 = vrot.slane %v572_v48, %v580_v49 }
 0x1f9   :  { %1332 = vmatpush1.bf16.msra.mxu1 %v1331_v55  ;;  %v862_v55 = vld [vmem:[#allocation10 + $0xf0] sm:$0xff]  ;;  %p1561_p7 = por %p1560_p6, %p1559_p5 }
 0x1fa   :  { %1334 = vmatprep.subr.bf16.mxu1 %v1333_v56  ;;  %v865_v56 = vld [vmem:[#allocation10 + $0x108] sm:$0xff]  ;;  %v1375_v58 = vpack.c.bf16 %v862_v55, %v860_v54 }
 0x1fb   :  { %v1377_v59 = vpack.c.bf16 %v867_v57, %v865_v56  ;;  %v981_v57 = vld [vmem:[#allocation11] sm:$0xff]  ;;  %p1562_p8 = pnand %p1561_p7, %p1555_p4 }
 0x1fd   :  { %1336 = vmatpush1.bf16.msra.mxu1 %v1335_v61  ;;  %v866_v61 = vld [vmem:[#allocation10 + $0x110] sm:$0xff] }
 0x1fe   :  { %1338 = vmatprep.subr.bf16.mxu1 %v1337_v62  ;;  %v869_v62 = vld [vmem:[#allocation10 + $0x128] sm:$0xff]  ;;  %v1379_v0 = vpack.c.bf16 %v866_v61, %v864_v60  ;;  %v999_v60 = vld [vmem:[#allocation11 + $0x90] sm:$0xff]  ;;  %v1000_v61 = vld [vmem:[#allocation11 + $0x98] sm:$0xff] }
 0x1ff   :  { %v1381_v2 = vpack.c.bf16 %v871_v63, %v869_v62 }
 0x201   :  { %1340 = vmatpush1.bf16.msra.mxu1 %v1339_v5  ;;  %v870_v5 = vld [vmem:[#allocation10 + $0x130] sm:$0xff] }
 0x202   :  { %1342 = vmatprep.subr.bf16.mxu1 %v1341_v6  ;;  %v873_v6 = vld [vmem:[#allocation10 + $0x148] sm:$0xff]  ;;  %v1383_v8 = vpack.c.bf16 %v870_v5, %v868_v3  ;;  %v983_v3 = vld [vmem:[#allocation11 + $0x10] sm:$0xff]  ;;  %v984_v5 = vld [vmem:[#allocation11 + $0x18] sm:$0xff] }
 0x205   :  { %1344 = vmatpush1.bf16.msra.mxu1 %v1343_v9  ;;  %v1385_v9 = vpack.c.bf16 %v875_v7, %v873_v6  ;;  %v1001_v6 = vld [vmem:[#allocation11 + $0xa0] sm:$0xff]  ;;  %v1002_v7 = vld [vmem:[#allocation11 + $0xa8] sm:$0xff] }
 0x208   :  { %824 = vmatmul.mubr.f32.vlgmr.msra.gmra.mrb[12].mxu1 %v1738_v1  ;;  %v842_v1 = vld [vmem:[#allocation10 + $0x50] sm:$0xff] }
 0x209   :  { %v1355_v28 = vpack.c.bf16 %v842_v1, %v840_v25  ;;  %v887_v25 = vld [vmem:[#allocation10 + $0x1b8] sm:$0xff]  ;;  %v1395_v1 = vpack.c.bf16 %v882_v23, %v880_v22  ;;  %v989_v22 = vld [vmem:[#allocation11 + $0x40] sm:$0xff]  ;;  %v990_v23 = vld [vmem:[#allocation11 + $0x48] sm:$0xff] }
 0x20a   :  { %v1397_v26 = vpack.c.bf16 %v887_v25, %v885_v24  ;;  %v1007_v24 = vld [vmem:[#allocation11 + $0xd0] sm:$0xff]  ;;  %v1008_v25 = vld [vmem:[#allocation11 + $0xd8] sm:$0xff] }
 0x20b   :  { %1356 = vmatpush1.bf16.msra.mxu0 %v1355_v28  ;;  %v886_v28 = vld [vmem:[#allocation10 + $0x1b0] sm:$0xff] }
 0x20c   :  { %1358 = vmatprep.subr.bf16.mxu0 %v1357_v29  ;;  %v889_v29 = vld [vmem:[#allocation10 + $0x1c8] sm:$0xff]  ;;  %v1399_v31 = vpack.c.bf16 %v886_v28, %v884_v27  ;;  %v991_v27 = vld [vmem:[#allocation11 + $0x50] sm:$0xff]  ;;  %v992_v28 = vld [vmem:[#allocation11 + $0x58] sm:$0xff] }
 0x20d   :  { %v1401_v32 = vpack.c.bf16 %v891_v30, %v889_v29  ;;  %v1009_v29 = vld [vmem:[#allocation11 + $0xe0] sm:$0xff]  ;;  %v1010_v30 = vld [vmem:[#allocation11 + $0xe8] sm:$0xff] }
 0x20f   :  { %1360 = vmatpush1.bf16.msra.mxu0 %v1359_v34  ;;  %v890_v34 = vld [vmem:[#allocation10 + $0x1d0] sm:$0xff] }
 0x210   :  { %1362 = vmatprep.subr.bf16.mxu0 %v1361_v35  ;;  %v1403_v35 = vpack.c.bf16 %v890_v34, %v888_v33  ;;  %v993_v33 = vld [vmem:[#allocation11 + $0x60] sm:$0xff]  ;;  %v994_v34 = vld [vmem:[#allocation11 + $0x68] sm:$0xff] }
 0x213   :  { %1364 = vmatpush1.bf16.msra.mxu0 %v1363_v40  ;;  %v894_v40 = vld [vmem:[#allocation10 + $0x1f0] sm:$0xff] }
 0x214   :  { %1366 = vmatprep.subr.bf16.mxu0 %v1365_v41  ;;  %v1407_v41 = vpack.c.bf16 %v894_v40, %v892_v39  ;;  %v995_v39 = vld [vmem:[#allocation11 + $0x70] sm:$0xff]  ;;  %v996_v40 = vld [vmem:[#allocation11 + $0x78] sm:$0xff] }
 0x217   :  { %1368 = vmatpush1.bf16.msra.mxu0 %v1367_v46 }
 0x218   :  { %1370 = vmatprep.subr.bf16.mxu0 %v1369_v47  ;;  %v576_v47 = vsub.s32 0, %v1708_v4 }
 0x21a   :  { %v577_v50 = vrot.slane %v572_v48, %v576_v47  ;;  %v901_v43 = vrot.slane %v896_v42, %v576_v47 }
 0x21b   :  { %1372 = vmatpush1.bf16.msra.mxu0 %v1371_v52 }
 0x21c   :  { %1374 = vmatprep.subr.bf16.mxu0 %v1373_v53 }
 0x21f   :  { %1376 = vmatpush1.bf16.msra.mxu0 %v1375_v58  ;;  %v982_v58 = vld [vmem:[#allocation11 + $0x8] sm:$0xff] }
 0x220   :  { %1378 = vmatprep.subr.bf16.mxu0 %v1377_v59  ;;  %v1411_v63 = vpack.c.bf16 %v982_v58, %v981_v57 }
 0x223   :  { %1380 = vmatpush1.bf16.msra.mxu0 %v1379_v0 }
 0x224   :  { %1382 = vmatprep.subr.bf16.mxu0 %v1381_v2  ;;  %v1413_v2 = vpack.c.bf16 %v1000_v61, %v999_v60 }
 0x227   :  { %1384 = vmatpush1.bf16.msra.mxu0 %v1383_v8  ;;  %v1415_v8 = vpack.c.bf16 %v984_v5, %v983_v3 }
 0x228   :  { %1386 = vmatprep.subr.bf16.mxu0 %v1385_v9  ;;  %v1417_v9 = vpack.c.bf16 %v1002_v7, %v1001_v6 }
 0x22b   :  { %1388 = vmatpush1.bf16.msra.mxu0 %v1387_v14  ;;  %v1419_v14 = vpack.c.bf16 %v986_v11, %v985_v10 }
 0x22c   :  { %1390 = vmatprep.subr.bf16.mxu0 %v1389_v15  ;;  %v1421_v15 = vpack.c.bf16 %v1004_v13, %v1003_v12 }
 0x22f   :  { %1392 = vmatpush1.bf16.msra.mxu0 %v1391_v20  ;;  %v1423_v20 = vpack.c.bf16 %v988_v17, %v987_v16 }
 0x230   :  { %1394 = vmatprep.subr.bf16.mxu0 %v1393_v21  ;;  %v1425_v21 = vpack.c.bf16 %v1006_v19, %v1005_v18 }
 0x233   :  { %1396 = vmatpush1.bf16.msra.mxu0 %v1395_v1  ;;  %v1427_v1 = vpack.c.bf16 %v990_v23, %v989_v22 }
 0x234   :  { %1398 = vmatprep.subr.bf16.mxu0 %v1397_v26  ;;  %v1429_v26 = vpack.c.bf16 %v1008_v25, %v1007_v24 }
 0x237   :  { %1400 = vmatpush1.bf16.msra.mxu0 %v1399_v31  ;;  %v1431_v31 = vpack.c.bf16 %v992_v28, %v991_v27 }
 0x238   :  { %1402 = vmatprep.subr.bf16.mxu0 %v1401_v32  ;;  %v1433_v32 = vpack.c.bf16 %v1010_v30, %v1009_v29 }
 0x23b   :  { %1404 = vmatpush1.bf16.msra.mxu0 %v1403_v35  ;;  %v1435_v35 = vpack.c.bf16 %v994_v34, %v993_v33 }
 0x23c   :  { %1406 = vmatprep.subr.bf16.mxu0 %v1405_v38  ;;  %v1437_v38 = vpack.c.bf16 %v1012_v37, %v1011_v36 }
 0x23f   :  { %1408 = vmatpush1.bf16.msra.mxu0 %v1407_v41  ;;  %v1439_v41 = vpack.c.bf16 %v996_v40, %v995_v39 }
 0x240   :  { %1410 = vmatprep.subr.bf16.mxu0 %v1409_v44  ;;  %v905_v44 = vrot.slane %v896_v42, %v580_v49 }
 0x299   :  { %v683_v45 = vpop.f32.mrb[0].mxu0 }
 0x29a   :  { %v685_v46 = vpop.f32.mrb[1].mxu0  ;;  %v684_v52 = vadd.f32 %v683_v45, %v577_v50 }
 0x29b   :  { %v686_v53 = vadd.f32 %v685_v46, %v581_v51 }
 0x2db   :  { %v825_v54 = vpop.f32.mrb[12].mxu1 }
 0x2dc   :  { %v1442_v55 = vadd.f32 %v825_v54, %v684_v52  ;;  %v827_v56 = vpop.f32.mrb[13].mxu1  ;;  %v1117_v54 = vld [vmem:[%s1781_s7] ss:$0 sm:$0xff] }
 0x2dd   :  { %v1444_v59 = vadd.f32 %v827_v56, %v686_v53 }
 0x2de   :  { %v830_v0 = vmax.f32 %v1442_v55, 0.0 }
 0x2df   :  { %v831_v62 = vmax.f32 %v1444_v59, 0.0 }
 0x2e1   :  { %972 = vmatprep.mubr.f32.mxu0 %v831_v62 }
 0x2e2   :  { %973 = vmatmul.mubr.f32.vlgmr.msra.gmra.mrb[2].mxu0 %v830_v0 }
 0x2e3   :  { %1412 = vmatpush3.bf16.msra.mxu0 %v1411_v63 }
 0x2e4   :  { %1414 = vmatprep.subr.bf16.mxu0 %v1413_v2 }
 0x2e7   :  { %1416 = vmatpush3.bf16.msra.mxu0 %v1415_v8 }
 0x2e8   :  { %1418 = vmatprep.subr.bf16.mxu0 %v1417_v9 }
 0x2eb   :  { %1420 = vmatpush3.bf16.msra.mxu0 %v1419_v14 }
 0x2ec   :  { %1422 = vmatprep.subr.bf16.mxu0 %v1421_v15 }
 0x2ef   :  { %1424 = vmatpush3.bf16.msra.mxu0 %v1423_v20 }
 0x2f0   :  { %1426 = vmatprep.subr.bf16.mxu0 %v1425_v21 }
 0x2f3   :  { %1428 = vmatpush3.bf16.msra.mxu0 %v1427_v1 }
 0x2f4   :  { %1430 = vmatprep.subr.bf16.mxu0 %v1429_v26 }
 0x2f7   :  { %1432 = vmatpush3.bf16.msra.mxu0 %v1431_v31 }
 0x2f8   :  { %1434 = vmatprep.subr.bf16.mxu0 %v1433_v32 }
 0x2fb   :  { %1436 = vmatpush3.bf16.msra.mxu0 %v1435_v35 }
 0x2fc   :  { %1438 = vmatprep.subr.bf16.mxu0 %v1437_v38 }
 0x2ff   :  { %1440 = vmatpush3.bf16.msra.mxu0 %v1439_v41 }
 0x3b5   :  { %v974_v45 = vpop.f32.mrb[2].mxu0 }
 0x3b6   :  { %v975_v46 = vadd.f32 %v974_v45, %v901_v43  ;;  %v976_v48 = vpop.f32.mrb[3].mxu0 }
 0x3b7   :  { %v977_v50 = vadd.f32 %v976_v48, %v905_v44 }
 0x3b8   :  { %v979_v52 = vmax.f32 %v975_v46, 0.0 }
 0x3b9   :  { %v980_v51 = vmax.f32 %v977_v50, 0.0 }
 0x3bb   :  { %1084 = vmatprep.mubr.f32.mxu0 %v980_v51 }
 0x3bc   :  { %1085 = vmatmul.mubr.f32.vlgmr.msra.gmra.mrb[4].mxu0 %v979_v52 }
 0x48f   :  { %v1150_v53 = vpop.f32.mrb[4].mxu0 }
 0x490   :  { %v1151_v55 = vpop.f32.mrb[5].mxu0 }
 0x491   :  { %v1152_v47 = vadd.f32 %v1151_v55, %v1150_v53 }
 0x493   :  { %v1087_v56 = vadd.f32 %v1152_v47, %v1117_v54 }
 0x495   :  { %1090 = vst [vmem:[#allocation13] sm:$0x3] %v1087_v56 }
 0x496   :  { %1565 = shalt.err (!%p1562_p8)
}
 0x497   :  { %s1566_s20 = scalar_lea.hbm %s1782_s8, 32 }
 0x498   :  { %p1567_p9 = scmp.ne.s32.totalorder %s1782_s8, %s1566_s20  ;;  %p1570_p10 = scmp.lt.u32.totalorder %s1566_s20, %s1782_s8 }
 0x49a   :  { %p1572_p11 = pnand %p1570_p10, %p1567_p9 }
 0x49c   :  { %1575 = shalt.err (!%p1572_p11)
}
 0x49d   :  { %1100 = dma.vmem_to_hbm [thread:$0]  %s1098_s21, 32, %s1782_s8, [#allocation7]  }
 0x49e   :  { %1582 = dma.done.wait [#allocation7], 32  }
 0x49f   :  { %1583 = vsyncadd [#allocation7], 4294967264 }
 0x4a0   :  { %1104 = vsyncpa [#allocation6], 1 }
 0x4a1   :  { %1105 = vsyncpa [#allocation9], 1 }
 0x4a2   :  { %1106 = vsyncpa [#allocation12], 1 }
 0x4a3   :  { %1107 = vsyncpa [#allocation7], 1 }

</bundles_post_ra>
